<compile_context>
chip_gen: v6e
topology: v6e:2x2x1
jax: 0.10.0
libtpu: 0.0.40
codegen_flags: <defaults>
</compile_context>

<pallas_src>
import numpy as np
import jax
import jax.numpy as jnp
from jax.experimental import pallas as pl
from jax.experimental.pallas import tpu as pltpu

# ---- static model / problem sizes -----------------------------------------
B = 4                  # independent graph-sets
N = 16                 # nodes per graph-set
G = 2                  # graphs per graph-set
GPAD = 8               # graph rows padded to 8 sublanes
F_IN = 16              # input_size
H0 = 32                # hidden_sizes[0]
H1 = 32                # hidden_sizes[1] (GATConv output)
HEADS = 4              # num_attention_heads
GATE_H = 128           # attention-pool gate MLP hidden width
OUT = 8                # output_size
LANE = 128

BT = 2                 # graph-sets folded into each grid step
NSTEP = B // BT
BTN = BT * N           # 32: stacked node rows per step
BTG = BT * GPAD        # 16: stacked graph rows per step

assert B % BT == 0
assert HEADS * H1 == LANE and GATE_H == LANE
assert H1 == BTN       # lets one set of 32-wide block selectors serve both groupings

# ---- packed-parameter row offsets (single resident [PA_ROWS, 128] block) ---
_R_WIN = 0                         # [F_IN,128]  w_in   (cols >= H0 zero)
_R_WALL = _R_WIN + F_IN            # [H0, 128]   fused GAT head weights
_R_WG1 = _R_WALL + H0              # [H1, 128]   gate MLP layer 1
_R_WOUT = _R_WG1 + H1              # [H1, 128]   output layer (cols >= OUT zero)
_R_P = _R_WOUT + H1                # [128,128]   block-diag ones: same-head selector
_R_JJ = _R_P + LANE                # [BTN,128]   delta(col % BTN == row): tiled identity
_R_HSEL = _R_JJ + BTN              # [8, 128]    head one-hot rows (rows >= HEADS zero)
_R_VEC = _R_HSEL + 8               # 8 vector rows
(_R_BIN, _R_BGAT, _R_ASRC, _R_ADST, _R_BG1, _R_WG2, _R_BOUT) = (
    _R_VEC, _R_VEC + 1, _R_VEC + 2, _R_VEC + 3, _R_VEC + 4, _R_VEC + 5, _R_VEC + 6)
PA_ROWS = _R_VEC + 8               # 288 rows -> ~147 KiB resident


def _lrelu(v, slope):
    return jnp.where(v > 0, v, slope * v)


def _rcp(v):
    # EUP approximate reciprocal + one Newton step (keeps ~f32 accuracy).
    r = pl.reciprocal(v, approx=True)
    return r * (2.0 - v * r)


def gnn_kernel(x_ref, adj_ref, gmask_ref, pa_ref, out_ref):
    neg = jnp.float32(-1e30)

    # static row views into the single packed parameter block
    w_in = pa_ref[_R_WIN:_R_WIN + F_IN, :]
    w_all = pa_ref[_R_WALL:_R_WALL + H0, :]
    w_g1 = pa_ref[_R_WG1:_R_WG1 + H1, :]
    w_out = pa_ref[_R_WOUT:_R_WOUT + H1, :]
    P = pa_ref[_R_P:_R_P + LANE, :]
    JJ = pa_ref[_R_JJ:_R_JJ + BTN, :]
    hsel8 = pa_ref[_R_HSEL:_R_HSEL + 8, :]
    b_in = pa_ref[_R_BIN:_R_BIN + 1, :]
    b_gat = pa_ref[_R_BGAT:_R_BGAT + 1, :]
    a_src = pa_ref[_R_ASRC:_R_ASRC + 1, :]
    a_dst = pa_ref[_R_ADST:_R_ADST + 1, :]
    b_g1 = pa_ref[_R_BG1:_R_BG1 + 1, :]
    w_g2 = pa_ref[_R_WG2:_R_WG2 + 1, :]
    b_out = pa_ref[_R_BOUT:_R_BOUT + 1, :]

    x = x_ref[...]                                   # [BTN, F_IN]
    adj = adj_ref[...]                               # [BTN, BTN] block-diagonal 0/1

    # ---- input_linear + LeakyReLU(0.1); padded cols (>= H0) stay exactly 0 --
    h0w = _lrelu(jnp.dot(x, w_in, preferred_element_type=jnp.float32) + b_in, 0.1)
    h0 = h0w[:, :H0]                                 # [BTN, H0]

    # ---- GATConv: fused head matmul, [BTN,H0] @ [H0,HEADS*H1] ----------------
    xh_all = jnp.dot(h0, w_all, preferred_element_type=jnp.float32)   # [BTN, 128]

    # attention logits for all heads & both folded batches packed along lanes:
    # column index = h*BTN + j  (head-major).  P broadcasts a per-head score
    # across its j-block; JJ moves per-node scores from rows onto the j lanes.
    a_d_full = jnp.dot(xh_all * a_dst, P, preferred_element_type=jnp.float32)
    s_pre = jnp.dot(xh_all * a_src, P, preferred_element_type=jnp.float32)
    ones_bb = jnp.ones((BTN, BTN), jnp.float32)
    a_s_full = jnp.dot(ones_bb, s_pre * JJ, preferred_element_type=jnp.float32)
    adj_full = jnp.dot(adj, JJ, preferred_element_type=jnp.float32)   # adj tiled per head

    logits = _lrelu(a_d_full + a_s_full, 0.2)
    masked = jnp.where(adj_full > 0, logits, neg)                     # [BTN, 128]

    # per-head softmax over j (masked entries underflow to exactly 0 in exp)
    m_h = jnp.max(masked.reshape(BTN, HEADS, BTN), axis=-1)           # [BTN, HEADS]
    m_h8 = jnp.concatenate(
        [m_h, jnp.zeros((BTN, 8 - HEADS), jnp.float32)], axis=1)      # pad K to 8
    m_full = jnp.dot(m_h8, hsel8, preferred_element_type=jnp.float32)
    e = jnp.exp(masked - m_full)                                      # [BTN, 128]
    alpha = e * _rcp(jnp.dot(e, P, preferred_element_type=jnp.float32))

    # one matmul replaces the 4 per-head alpha@xh passes:
    # xh_stack rows ordered (head-major, node-minor) to match alpha's columns.
    xh_stack = jnp.concatenate(
        [xh_all[:, h * H1:(h + 1) * H1] for h in range(HEADS)], axis=0)  # [128, H1]
    acc = jnp.dot(alpha, xh_stack, preferred_element_type=jnp.float32)   # [BTN, H1]
    # concat=False => mean over heads + bias; module applies LeakyReLU(0.1)
    h1 = _lrelu(acc * (1.0 / HEADS) + b_gat[:, :H1], 0.1)

    # ---- AttentionalAggregation pooling --------------------------------------
    g1 = jnp.maximum(
        jnp.dot(h1, w_g1, preferred_element_type=jnp.float32) + b_g1, 0.0)  # [BTN,128]
    # gate via VPU multiply + lane reduce; gate_nn bias b_g2 cancels in softmax.
    gate = jnp.sum(g1 * w_g2, axis=-1, keepdims=True)                       # [BTN, 1]
    glog = jnp.where(gmask_ref[...] > 0, gate.T, neg)                       # [BTG, BTN]
    gm = jnp.max(glog, axis=-1, keepdims=True)
    ge = jnp.exp(glog - gm)                          # padded rows -> uniform, sliced away
    pw = ge * _rcp(jnp.sum(ge, axis=-1, keepdims=True))
    emb = jnp.dot(pw, h1, preferred_element_type=jnp.float32)               # [BTG, H1]

    # ---- output_layer (lane-dense [BTG, 128] store) ---------------------------
    out_ref[...] = jnp.dot(emb, w_out, preferred_element_type=jnp.float32) + b_out


def rare_label_gnn_forward(x_steps, adj_steps, gmask_steps, params):
    nstep = x_steps.shape[0]
    out = pl.pallas_call(
        gnn_kernel,
        out_shape=jax.ShapeDtypeStruct((nstep, BTG, LANE), jnp.float32),
        grid=(nstep,),
        in_specs=[
            pl.BlockSpec((None, BTN, F_IN), lambda s: (s, 0, 0)),
            pl.BlockSpec((None, BTN, BTN), lambda s: (s, 0, 0)),
            pl.BlockSpec((None, BTG, BTN), lambda s: (s, 0, 0)),
            pl.BlockSpec((PA_ROWS, LANE), lambda s: (0, 0)),   # weights: resident
        ],
        out_specs=pl.BlockSpec((None, BTG, LANE), lambda s: (s, 0, 0)),
        compiler_params=pltpu.CompilerParams(dimension_semantics=("parallel",)),
    )(x_steps, adj_steps, gmask_steps, params)
    return out.reshape(nstep * BT, GPAD, LANE)[:, :G, :OUT]


# ---- host-side parameter packing -------------------------------------------
def pack_params(p):
    def zrow(r):
        return jnp.zeros((r, LANE), jnp.float32)

    w_in_pad = zrow(F_IN).at[:, :H0].set(p["w_in"])
    w_all = p["w_gat"].transpose(1, 0, 2).reshape(H0, HEADS * H1)      # [32,128]
    w_g1 = p["w_g1"]                                                   # [32,128]
    w_out_pad = zrow(H1).at[:, :OUT].set(p["w_out"])

    # structural 0/1 selector constants (depend only on HEADS / BT / N)
    P = np.zeros((LANE, LANE), np.float32)        # same-head block-diag of ones
    JJ = np.zeros((BTN, LANE), np.float32)        # delta(col % BTN == row)
    hsel = np.zeros((8, LANE), np.float32)        # head one-hot rows
    for h in range(HEADS):
        P[h * BTN:(h + 1) * BTN, h * BTN:(h + 1) * BTN] = 1.0
        JJ[np.arange(BTN), h * BTN + np.arange(BTN)] = 1.0
        hsel[h, h * BTN:(h + 1) * BTN] = 1.0

    b_in_pad = zrow(1).at[:, :H0].set(p["b_in"])
    b_gat_pad = zrow(1).at[:, :H1].set(p["b_gat"])
    a_src_row = p["a_src"].reshape(1, HEADS * H1)
    a_dst_row = p["a_dst"].reshape(1, HEADS * H1)
    w_g2_row = p["w_g2"].T                                             # [1,128]
    b_out_pad = zrow(1).at[:, :OUT].set(p["b_out"])
    vec = jnp.concatenate([b_in_pad, b_gat_pad, a_src_row, a_dst_row,
                           p["b_g1"], w_g2_row, b_out_pad, zrow(1)], axis=0)

    params = jnp.concatenate(
        [w_in_pad, w_all, w_g1, w_out_pad,
         jnp.asarray(P), jnp.asarray(JJ), jnp.asarray(hsel), vec], axis=0)
    assert params.shape == (PA_ROWS, LANE)
    return params


# ---- pure-JAX reference (same math, used only as a correctness check) ------
def reference_forward(x, adj, gmask, p):
    def lr(v, s):
        return jnp.where(v > 0, v, s * v)
    h = lr(x @ p["w_in"] + p["b_in"], 0.1)
    acc = jnp.zeros((N, H1), jnp.float32)
    for hd in range(HEADS):
        xh = h @ p["w_gat"][hd]
        a_s = jnp.sum(xh * p["a_src"][hd:hd + 1], -1, keepdims=True)
        a_d = jnp.sum(xh * p["a_dst"][hd:hd + 1], -1, keepdims=True)
        logits = lr(a_d + a_s.T, 0.2)
        logits = jnp.where(adj > 0, logits, -1e30)
        m = jnp.max(logits, -1, keepdims=True)
        e = jnp.exp(logits - m) * adj
        alpha = e / jnp.sum(e, -1, keepdims=True)
        acc = acc + alpha @ xh
    h = lr(acc / HEADS + p["b_gat"], 0.1)
    g1 = jnp.maximum(h @ p["w_g1"] + p["b_g1"], 0.0)
    gate = g1 @ p["w_g2"] + p["b_g2"]
    glog = jnp.where(gmask > 0, gate.T, -1e30)
    gm = jnp.max(glog, -1, keepdims=True)
    ge = jnp.exp(glog - gm) * gmask
    pw = ge / jnp.sum(ge, -1, keepdims=True)
    emb = pw @ h
    return emb @ p["w_out"] + p["b_out"]


def make_params(key):
    ks = jax.random.split(key, 12)
    s = 0.1
    return {
        "w_in":  s * jax.random.normal(ks[0], (F_IN, H0), jnp.float32),
        "b_in":  s * jax.random.normal(ks[1], (1, H0), jnp.float32),
        "w_gat": s * jax.random.normal(ks[2], (HEADS, H0, H1), jnp.float32),
        "a_src": s * jax.random.normal(ks[3], (HEADS, H1), jnp.float32),
        "a_dst": s * jax.random.normal(ks[4], (HEADS, H1), jnp.float32),
        "b_gat": s * jax.random.normal(ks[5], (1, H1), jnp.float32),
        "w_g1":  s * jax.random.normal(ks[6], (H1, GATE_H), jnp.float32),
        "b_g1":  s * jax.random.normal(ks[7], (1, GATE_H), jnp.float32),
        "w_g2":  s * jax.random.normal(ks[8], (GATE_H, 1), jnp.float32),
        "b_g2":  s * jax.random.normal(ks[9], (1, 1), jnp.float32),
        "w_out": s * jax.random.normal(ks[10], (H1, OUT), jnp.float32),
        "b_out": s * jax.random.normal(ks[11], (1, OUT), jnp.float32),
    }


def make_graph():
    # Two graphs of 8 nodes each: undirected ring within each graph.
    per = N // G
    edges = []
    for g in range(G):
        base = g * per
        for i in range(per):
            j = (i + 1) % per
            edges.append((base + i, base + j))   # (source, target)
            edges.append((base + j, base + i))
    edge_index = np.asarray(edges, dtype=np.int32).T
    adj = np.zeros((N, N), np.float32)
    adj[edge_index[1], edge_index[0]] = 1.0                  # adj[target, source]
    adj[np.arange(N), np.arange(N)] = 1.0                    # GATConv add_self_loops
    batch = np.repeat(np.arange(G), per).astype(np.int32)
    gmask = np.zeros((G, N), np.float32)
    gmask[batch, np.arange(N)] = 1.0
    return adj, gmask


if __name__ == "__main__":
    key = jax.random.PRNGKey(0)
    kx, kp = jax.random.split(key)
    x_b = jax.random.normal(kx, (B, N, F_IN), jnp.float32)

    adj_np, gmask_np = make_graph()                          # [N,N], [G,N]
    gmask_pad = np.zeros((GPAD, N), np.float32)
    gmask_pad[:G] = gmask_np

    # Fold BT consecutive graph-sets per grid step: block-diagonal adjacency
    # and graph-membership so one kernel instance handles BT independent sets.
    adj_steps = np.zeros((NSTEP, BTN, BTN), np.float32)
    gmask_steps = np.zeros((NSTEP, BTG, BTN), np.float32)
    for s in range(NSTEP):
        for bl in range(BT):
            b = s * BT + bl
            adj_steps[s, bl * N:(bl + 1) * N, bl * N:(bl + 1) * N] = adj_np
            gmask_steps[s, bl * GPAD:(bl + 1) * GPAD, bl * N:(bl + 1) * N] = gmask_pad
            del b

    params = make_params(kp)
    packed = pack_params(params)

    x_steps = x_b.reshape(NSTEP, BTN, F_IN)
    out = rare_label_gnn_forward(x_steps, jnp.asarray(adj_steps),
                                 jnp.asarray(gmask_steps), packed)
    out = jax.block_until_ready(out)

    ref = jnp.stack([reference_forward(x_b[b], jnp.asarray(adj_np),
                                       jnp.asarray(gmask_np), params)
                     for b in range(B)])
    np.testing.assert_allclose(np.asarray(out), np.asarray(ref), rtol=1e-4, atol=1e-4)

    print("KERNEL_OK")
</pallas_src>

<mosaic_0001>
module attributes {stable_mosaic.version = 11 : i64} {
  func.func @gnn_kernel(%arg0: i32, %arg1: memref<1x32x16xf32, #tpu.memory_space<vmem>>, %arg2: memref<1x32x32xf32, #tpu.memory_space<vmem>>, %arg3: memref<1x16x32xf32, #tpu.memory_space<vmem>>, %arg4: memref<288x128xf32, #tpu.memory_space<vmem>>, %arg5: memref<1x16x128xf32, #tpu.memory_space<vmem>>) attributes {dimension_semantics = [#tpu.dimension_semantics<parallel>], iteration_bounds = array<i64: 2>, scalar_prefetch = 0 : i64, scratch_operands = 0 : i64, tpu.core_type = #tpu.core_type<tc>, window_params = [{transform_indices = @transform_0, window_bounds = array<i64: 1, 32, 16>}, {transform_indices = @transform_1, window_bounds = array<i64: 1, 32, 32>}, {transform_indices = @transform_2, window_bounds = array<i64: 1, 16, 32>}, {pipeline_mode = #tpu.pipeline_mode<synchronous>, transform_indices = @transform_3, window_bounds = array<i64: 288, 128>}, {transform_indices = @transform_4, window_bounds = array<i64: 1, 16, 128>}]} {
    %c0 = arith.constant 0 : index
    %c0_0 = arith.constant 0 : index
    %0 = vector.load %arg4[%c0, %c0_0] : memref<288x128xf32, #tpu.memory_space<vmem>>, vector<16x128xf32>
    %c16 = arith.constant 16 : index
    %c0_1 = arith.constant 0 : index
    %1 = vector.load %arg4[%c16, %c0_1] : memref<288x128xf32, #tpu.memory_space<vmem>>, vector<32x128xf32>
    %c48 = arith.constant 48 : index
    %c0_2 = arith.constant 0 : index
    %2 = vector.load %arg4[%c48, %c0_2] : memref<288x128xf32, #tpu.memory_space<vmem>>, vector<32x128xf32>
    %c80 = arith.constant 80 : index
    %c0_3 = arith.constant 0 : index
    %3 = vector.load %arg4[%c80, %c0_3] : memref<288x128xf32, #tpu.memory_space<vmem>>, vector<32x128xf32>
    %c112 = arith.constant 112 : index
    %c0_4 = arith.constant 0 : index
    %4 = vector.load %arg4[%c112, %c0_4] : memref<288x128xf32, #tpu.memory_space<vmem>>, vector<128x128xf32>
    %c240 = arith.constant 240 : index
    %c0_5 = arith.constant 0 : index
    %5 = vector.load %arg4[%c240, %c0_5] : memref<288x128xf32, #tpu.memory_space<vmem>>, vector<32x128xf32>
    %c272 = arith.constant 272 : index
    %c0_6 = arith.constant 0 : index
    %6 = vector.load %arg4[%c272, %c0_6] : memref<288x128xf32, #tpu.memory_space<vmem>>, vector<8x128xf32>
    %c280 = arith.constant 280 : index
    %c0_7 = arith.constant 0 : index
    %7 = vector.load %arg4[%c280, %c0_7] : memref<288x128xf32, #tpu.memory_space<vmem>>, vector<1x128xf32>
    %c281 = arith.constant 281 : index
    %c0_8 = arith.constant 0 : index
    %8 = vector.load %arg4[%c281, %c0_8] : memref<288x128xf32, #tpu.memory_space<vmem>>, vector<1x128xf32>
    %c282 = arith.constant 282 : index
    %c0_9 = arith.constant 0 : index
    %9 = vector.load %arg4[%c282, %c0_9] : memref<288x128xf32, #tpu.memory_space<vmem>>, vector<1x128xf32>
    %c283 = arith.constant 283 : index
    %c0_10 = arith.constant 0 : index
    %10 = vector.load %arg4[%c283, %c0_10] : memref<288x128xf32, #tpu.memory_space<vmem>>, vector<1x128xf32>
    %c284 = arith.constant 284 : index
    %c0_11 = arith.constant 0 : index
    %11 = vector.load %arg4[%c284, %c0_11] : memref<288x128xf32, #tpu.memory_space<vmem>>, vector<1x128xf32>
    %c285 = arith.constant 285 : index
    %c0_12 = arith.constant 0 : index
    %12 = vector.load %arg4[%c285, %c0_12] : memref<288x128xf32, #tpu.memory_space<vmem>>, vector<1x128xf32>
    %c286 = arith.constant 286 : index
    %c0_13 = arith.constant 0 : index
    %13 = vector.load %arg4[%c286, %c0_13] : memref<288x128xf32, #tpu.memory_space<vmem>>, vector<1x128xf32>
    %c0_14 = arith.constant 0 : index
    %c0_15 = arith.constant 0 : index
    %c0_16 = arith.constant 0 : index
    %14 = vector.load %arg1[%c0_14, %c0_15, %c0_16] : memref<1x32x16xf32, #tpu.memory_space<vmem>>, vector<1x32x16xf32>
    %15 = vector.shape_cast %14 : vector<1x32x16xf32> to vector<32x16xf32>
    %c0_17 = arith.constant 0 : index
    %c0_18 = arith.constant 0 : index
    %c0_19 = arith.constant 0 : index
    %16 = vector.load %arg2[%c0_17, %c0_18, %c0_19] : memref<1x32x32xf32, #tpu.memory_space<vmem>>, vector<1x32x32xf32>
    %17 = vector.shape_cast %16 : vector<1x32x32xf32> to vector<32x32xf32>
    %cst = arith.constant dense<0.000000e+00> : vector<32x128xf32>
    %18 = tpu.matmul %15, %0, %cst {dimension_numbers = #tpu.dot_dimension_numbers<[1], [0], [0], [1], [0, 0, 1, 1], [], []>} : vector<32x16xf32>, vector<16x128xf32>, vector<32x128xf32> -> vector<32x128xf32>
    %19 = vector.broadcast %7 : vector<1x128xf32> to vector<32x128xf32>
    %20 = arith.addf %18, %19 : vector<32x128xf32>
    %cst_20 = arith.constant 0.000000e+00 : f32
    %21 = vector.broadcast %cst_20 : f32 to vector<32x128xf32>
    %22 = arith.cmpf ogt, %20, %21 : vector<32x128xf32>
    %cst_21 = arith.constant 1.000000e-01 : f32
    %23 = vector.broadcast %cst_21 : f32 to vector<32x128xf32>
    %24 = arith.mulf %23, %20 : vector<32x128xf32>
    %25 = arith.select %22, %20, %24 : vector<32x128xi1>, vector<32x128xf32>
    %26 = vector.extract_strided_slice %25 {offsets = [0, 0], sizes = [32, 32], strides = [1, 1]} : vector<32x128xf32> to vector<32x32xf32>
    %cst_22 = arith.constant dense<0.000000e+00> : vector<32x128xf32>
    %27 = tpu.matmul %26, %1, %cst_22 {dimension_numbers = #tpu.dot_dimension_numbers<[1], [0], [0], [1], [0, 0, 1, 1], [], []>} : vector<32x32xf32>, vector<32x128xf32>, vector<32x128xf32> -> vector<32x128xf32>
    %28 = vector.broadcast %10 : vector<1x128xf32> to vector<32x128xf32>
    %29 = arith.mulf %27, %28 : vector<32x128xf32>
    %cst_23 = arith.constant dense<0.000000e+00> : vector<32x128xf32>
    %30 = tpu.matmul %29, %4, %cst_23 {dimension_numbers = #tpu.dot_dimension_numbers<[1], [0], [0], [1], [0, 0, 1, 1], [], []>} : vector<32x128xf32>, vector<128x128xf32>, vector<32x128xf32> -> vector<32x128xf32>
    %31 = vector.broadcast %9 : vector<1x128xf32> to vector<32x128xf32>
    %32 = arith.mulf %27, %31 : vector<32x128xf32>
    %cst_24 = arith.constant dense<0.000000e+00> : vector<32x128xf32>
    %33 = tpu.matmul %32, %4, %cst_24 {dimension_numbers = #tpu.dot_dimension_numbers<[1], [0], [0], [1], [0, 0, 1, 1], [], []>} : vector<32x128xf32>, vector<128x128xf32>, vector<32x128xf32> -> vector<32x128xf32>
    %cst_25 = arith.constant 1.000000e+00 : f32
    %34 = vector.broadcast %cst_25 : f32 to vector<32x32xf32>
    %35 = arith.mulf %33, %5 : vector<32x128xf32>
    %cst_26 = arith.constant dense<0.000000e+00> : vector<32x128xf32>
    %36 = tpu.matmul %34, %35, %cst_26 {dimension_numbers = #tpu.dot_dimension_numbers<[1], [0], [0], [1], [0, 0, 1, 1], [], []>} : vector<32x32xf32>, vector<32x128xf32>, vector<32x128xf32> -> vector<32x128xf32>
    %cst_27 = arith.constant dense<0.000000e+00> : vector<32x128xf32>
    %37 = tpu.matmul %17, %5, %cst_27 {dimension_numbers = #tpu.dot_dimension_numbers<[1], [0], [0], [1], [0, 0, 1, 1], [], []>} : vector<32x32xf32>, vector<32x128xf32>, vector<32x128xf32> -> vector<32x128xf32>
    %38 = arith.addf %30, %36 : vector<32x128xf32>
    %cst_28 = arith.constant 0.000000e+00 : f32
    %39 = vector.broadcast %cst_28 : f32 to vector<32x128xf32>
    %40 = arith.cmpf ogt, %38, %39 : vector<32x128xf32>
    %cst_29 = arith.constant 2.000000e-01 : f32
    %41 = vector.broadcast %cst_29 : f32 to vector<32x128xf32>
    %42 = arith.mulf %41, %38 : vector<32x128xf32>
    %43 = arith.select %40, %38, %42 : vector<32x128xi1>, vector<32x128xf32>
    %cst_30 = arith.constant 0.000000e+00 : f32
    %44 = vector.broadcast %cst_30 : f32 to vector<32x128xf32>
    %45 = arith.cmpf ogt, %37, %44 : vector<32x128xf32>
    %cst_31 = arith.constant -1.000000e+30 : f32
    %46 = vector.broadcast %cst_31 : f32 to vector<32x128xf32>
    %47 = arith.select %45, %43, %46 : vector<32x128xi1>, vector<32x128xf32>
    %48 = vector.shape_cast %47 : vector<32x128xf32> to vector<32x4x32xf32>
    %cst_32 = arith.constant dense<0xFF800000> : vector<32x4xf32>
    %49 = vector.multi_reduction <maximumf>, %48, %cst_32 [2] : vector<32x4x32xf32> to vector<32x4xf32>
    %cst_33 = arith.constant 0.000000e+00 : f32
    %50 = vector.broadcast %cst_33 : f32 to vector<32x4xf32>
    %51 = tpu.concatenate %49, %50 in 1 : vector<32x4xf32>, vector<32x4xf32> -> vector<32x8xf32>
    %cst_34 = arith.constant dense<0.000000e+00> : vector<32x128xf32>
    %52 = tpu.matmul %51, %6, %cst_34 {dimension_numbers = #tpu.dot_dimension_numbers<[1], [0], [0], [1], [0, 0, 1, 1], [], []>} : vector<32x8xf32>, vector<8x128xf32>, vector<32x128xf32> -> vector<32x128xf32>
    %53 = arith.subf %47, %52 : vector<32x128xf32>
    %54 = math.exp %53 : vector<32x128xf32>
    %cst_35 = arith.constant dense<0.000000e+00> : vector<32x128xf32>
    %55 = tpu.matmul %54, %4, %cst_35 {dimension_numbers = #tpu.dot_dimension_numbers<[1], [0], [0], [1], [0, 0, 1, 1], [], []>} : vector<32x128xf32>, vector<128x128xf32>, vector<32x128xf32> -> vector<32x128xf32>
    %56 = tpu.reciprocal %55 {approx = true} : vector<32x128xf32> -> vector<32x128xf32>
    %57 = arith.mulf %55, %56 : vector<32x128xf32>
    %cst_36 = arith.constant 2.000000e+00 : f32
    %58 = vector.broadcast %cst_36 : f32 to vector<32x128xf32>
    %59 = arith.subf %58, %57 : vector<32x128xf32>
    %60 = arith.mulf %56, %59 : vector<32x128xf32>
    %61 = arith.mulf %54, %60 : vector<32x128xf32>
    %62 = vector.extract_strided_slice %27 {offsets = [0, 0], sizes = [32, 32], strides = [1, 1]} : vector<32x128xf32> to vector<32x32xf32>
    %63 = vector.extract_strided_slice %27 {offsets = [0, 32], sizes = [32, 32], strides = [1, 1]} : vector<32x128xf32> to vector<32x32xf32>
    %64 = vector.extract_strided_slice %27 {offsets = [0, 64], sizes = [32, 32], strides = [1, 1]} : vector<32x128xf32> to vector<32x32xf32>
    %65 = vector.extract_strided_slice %27 {offsets = [0, 96], sizes = [32, 32], strides = [1, 1]} : vector<32x128xf32> to vector<32x32xf32>
    %66 = tpu.concatenate %62, %63, %64, %65 in 0 : vector<32x32xf32>, vector<32x32xf32>, vector<32x32xf32>, vector<32x32xf32> -> vector<128x32xf32>
    %cst_37 = arith.constant dense<0.000000e+00> : vector<32x32xf32>
    %67 = tpu.matmul %61, %66, %cst_37 {dimension_numbers = #tpu.dot_dimension_numbers<[1], [0], [0], [1], [0, 0, 1, 1], [], []>} : vector<32x128xf32>, vector<128x32xf32>, vector<32x32xf32> -> vector<32x32xf32>
    %cst_38 = arith.constant 2.500000e-01 : f32
    %68 = vector.broadcast %cst_38 : f32 to vector<32x32xf32>
    %69 = arith.mulf %67, %68 : vector<32x32xf32>
    %70 = vector.extract_strided_slice %8 {offsets = [0, 0], sizes = [1, 32], strides = [1, 1]} : vector<1x128xf32> to vector<1x32xf32>
    %71 = vector.broadcast %70 : vector<1x32xf32> to vector<32x32xf32>
    %72 = arith.addf %69, %71 : vector<32x32xf32>
    %cst_39 = arith.constant 0.000000e+00 : f32
    %73 = vector.broadcast %cst_39 : f32 to vector<32x32xf32>
    %74 = arith.cmpf ogt, %72, %73 : vector<32x32xf32>
    %cst_40 = arith.constant 1.000000e-01 : f32
    %75 = vector.broadcast %cst_40 : f32 to vector<32x32xf32>
    %76 = arith.mulf %75, %72 : vector<32x32xf32>
    %77 = arith.select %74, %72, %76 : vector<32x32xi1>, vector<32x32xf32>
    %cst_41 = arith.constant dense<0.000000e+00> : vector<32x128xf32>
    %78 = tpu.matmul %77, %2, %cst_41 {dimension_numbers = #tpu.dot_dimension_numbers<[1], [0], [0], [1], [0, 0, 1, 1], [], []>} : vector<32x32xf32>, vector<32x128xf32>, vector<32x128xf32> -> vector<32x128xf32>
    %79 = vector.broadcast %11 : vector<1x128xf32> to vector<32x128xf32>
    %80 = arith.addf %78, %79 : vector<32x128xf32>
    %cst_42 = arith.constant 0.000000e+00 : f32
    %81 = vector.broadcast %cst_42 : f32 to vector<32x128xf32>
    %82 = arith.maximumf %80, %81 : vector<32x128xf32>
    %83 = vector.broadcast %12 : vector<1x128xf32> to vector<32x128xf32>
    %84 = arith.mulf %82, %83 : vector<32x128xf32>
    %cst_43 = arith.constant dense<0.000000e+00> : vector<32xf32>
    %85 = vector.multi_reduction <add>, %84, %cst_43 [1] : vector<32x128xf32> to vector<32xf32>
    %86 = vector.shape_cast %85 : vector<32xf32> to vector<32x1xf32>
    %c0_44 = arith.constant 0 : index
    %c0_45 = arith.constant 0 : index
    %c0_46 = arith.constant 0 : index
    %87 = vector.load %arg3[%c0_44, %c0_45, %c0_46] : memref<1x16x32xf32, #tpu.memory_space<vmem>>, vector<1x16x32xf32>
    %88 = vector.shape_cast %87 : vector<1x16x32xf32> to vector<16x32xf32>
    %cst_47 = arith.constant 0.000000e+00 : f32
    %89 = vector.broadcast %cst_47 : f32 to vector<16x32xf32>
    %90 = arith.cmpf ogt, %88, %89 : vector<16x32xf32>
    %91 = tpu.transpose %86, [1, 0] : vector<32x1xf32> -> vector<1x32xf32>
    %cst_48 = arith.constant -1.000000e+30 : f32
    %92 = vector.shape_cast %91 : vector<1x32xf32> to vector<1x32xf32>
    %93 = vector.broadcast %92 : vector<1x32xf32> to vector<16x32xf32>
    %94 = vector.broadcast %cst_48 : f32 to vector<16x32xf32>
    %95 = arith.select %90, %93, %94 : vector<16x32xi1>, vector<16x32xf32>
    %cst_49 = arith.constant dense<0xFF800000> : vector<16xf32>
    %96 = vector.multi_reduction <maximumf>, %95, %cst_49 [1] : vector<16x32xf32> to vector<16xf32>
    %97 = vector.shape_cast %96 : vector<16xf32> to vector<16x1xf32>
    %98 = vector.broadcast %97 : vector<16x1xf32> to vector<16x32xf32>
    %99 = arith.subf %95, %98 : vector<16x32xf32>
    %100 = math.exp %99 : vector<16x32xf32>
    %cst_50 = arith.constant dense<0.000000e+00> : vector<16xf32>
    %101 = vector.multi_reduction <add>, %100, %cst_50 [1] : vector<16x32xf32> to vector<16xf32>
    %102 = vector.shape_cast %101 : vector<16xf32> to vector<16x1xf32>
    %103 = tpu.reciprocal %102 {approx = true} : vector<16x1xf32> -> vector<16x1xf32>
    %104 = arith.mulf %102, %103 : vector<16x1xf32>
    %cst_51 = arith.constant 2.000000e+00 : f32
    %105 = vector.broadcast %cst_51 : f32 to vector<16x1xf32>
    %106 = arith.subf %105, %104 : vector<16x1xf32>
    %107 = arith.mulf %103, %106 : vector<16x1xf32>
    %108 = vector.broadcast %107 : vector<16x1xf32> to vector<16x32xf32>
    %109 = arith.mulf %100, %108 : vector<16x32xf32>
    %cst_52 = arith.constant dense<0.000000e+00> : vector<16x32xf32>
    %110 = tpu.matmul %109, %77, %cst_52 {dimension_numbers = #tpu.dot_dimension_numbers<[1], [0], [0], [1], [0, 0, 1, 1], [], []>} : vector<16x32xf32>, vector<32x32xf32>, vector<16x32xf32> -> vector<16x32xf32>
    %cst_53 = arith.constant dense<0.000000e+00> : vector<16x128xf32>
    %111 = tpu.matmul %110, %3, %cst_53 {dimension_numbers = #tpu.dot_dimension_numbers<[1], [0], [0], [1], [0, 0, 1, 1], [], []>} : vector<16x32xf32>, vector<32x128xf32>, vector<16x128xf32> -> vector<16x128xf32>
    %112 = vector.broadcast %13 : vector<1x128xf32> to vector<16x128xf32>
    %113 = arith.addf %111, %112 : vector<16x128xf32>
    %c0_54 = arith.constant 0 : index
    %c0_55 = arith.constant 0 : index
    %c0_56 = arith.constant 0 : index
    %114 = vector.load %arg5[%c0_54, %c0_55, %c0_56] : memref<1x16x128xf32, #tpu.memory_space<vmem>>, vector<1x16x128xf32>
    %115 = vector.shape_cast %114 : vector<1x16x128xf32> to vector<16x128xf32>
    %116 = vector.shape_cast %113 : vector<16x128xf32> to vector<1x16x128xf32>
    tpu.vector_store %arg5[%c0_54, %c0_55, %c0_56], %116 {strides = array<i32>} : memref<1x16x128xf32, #tpu.memory_space<vmem>>, vector<1x16x128xf32>,
    return
  }
  func.func @transform_0(%arg0: i32) -> (i32, i32, i32) {
    %c0_i32 = arith.constant 0 : i32
    %c0_i32_0 = arith.constant 0 : i32
    %c0_i32_1 = arith.constant 0 : i32
    return %arg0, %c0_i32, %c0_i32_0 : i32, i32, i32
  }
  func.func @transform_1(%arg0: i32) -> (i32, i32, i32) {
    %c0_i32 = arith.constant 0 : i32
    %c0_i32_0 = arith.constant 0 : i32
    %c0_i32_1 = arith.constant 0 : i32
    return %arg0, %c0_i32, %c0_i32_0 : i32, i32, i32
  }
  func.func @transform_2(%arg0: i32) -> (i32, i32, i32) {
    %c0_i32 = arith.constant 0 : i32
    %c0_i32_0 = arith.constant 0 : i32
    %c0_i32_1 = arith.constant 0 : i32
    return %arg0, %c0_i32, %c0_i32_0 : i32, i32, i32
  }
  func.func @transform_3(%arg0: i32) -> (i32, i32) {
    %c0_i32 = arith.constant 0 : i32
    %c0_i32_0 = arith.constant 0 : i32
    %c0_i32_1 = arith.constant 0 : i32
    return %c0_i32, %c0_i32_0 : i32, i32
  }
  func.func @transform_4(%arg0: i32) -> (i32, i32, i32) {
    %c0_i32 = arith.constant 0 : i32
    %c0_i32_0 = arith.constant 0 : i32
    %c0_i32_1 = arith.constant 0 : i32
    return %arg0, %c0_i32, %c0_i32_0 : i32, i32, i32
  }
}

</mosaic_0001>

<bundles_post_ra>
// kernel: tpu_custom_call.1
= control target key start
LH: loop header
LB: loop body
LE: loop exit
PB: predicated region body
PF: predicated region fallthrough
CT: control target
= control target key end

     0   :  { %9 = vsyncpa [#allocation3], 0  ;;  %s3571_s0 = inlined_call_operand.vmem [shape: f32[2,32,16], index: 0, kind: input, shape index: {}]   ;;  %s3572_s1 = inlined_call_operand.vmem [shape: f32[2,32,32], index: 1, kind: input, shape index: {}]   ;;  %s3573_s2 = inlined_call_operand.vmem [shape: f32[2,16,32], index: 2, kind: input, shape index: {}]   ;;  %s3574_s3 = inlined_call_operand.hbm [shape: f32[288,128], index: 3, kind: input, shape index: {}]   ;;  %s3575_s4 = inlined_call_operand.hbm [shape: f32[2,16,128], index: 4, kind: output, shape index: {}]  }
   0x1   :  { %10 = vsyncpa [#allocation4], 0 }
   0x2   :  { %12 = vsyncpa [#allocation4 + $0x1], 0  ;;  %s3013_s15 = smov 0   ;;  %s3015_s16 = smov 0  }
   0x3   :  { %s3017_s17 = smov 0   ;;  %s3019_s18 = smov 0  }
   0x4 LB: > { %s3034_s19 = sadd.s32 4294967295, %s2973_s18   ;;  %s2358_s20 = sadd.s32 4294967294, %s2973_s18   ;;  %s2973_s18 = sphi %s3019_s18, %s3583_s18   ;;  %s2969_s17 = sphi %s3017_s17, %s3582_s17   ;;  %s2965_s16 = sphi %s3015_s16, %s3581_s16   ;;  %s2961_s15 = sphi %s3013_s15, %s3580_s15  }
   0x5   : > { %s3038_s21 = sadd.s32 1, %s2973_s18   ;;  %s124_s22 = sadd.s32 1, %s2969_s17 }
   0x6   : > { %s121_s23 = ssub.s32 %s2973_s18, %s3038_s21  ;;  %p134_p0 = scmp.ne.s32.totalorder %s2969_s17, %s2965_s16 }
   0x7   : > { %p122_p1 = scmp.eq.s32.totalorder %s121_s23, 0  ;;  %p135_p2 = scmp.eq.s32.totalorder %s3034_s19, 1 }
   0x8   : > { %p140_p3 = scmp.ne.s32.totalorder %s2965_s16, %s2961_s15  ;;  %p141_p4 = scmp.eq.s32.totalorder %s2358_s20, 1 }
   0x9   : > { %s3049_s24 = scalar_select %p122_p1, %s2969_s17, %s124_s22  }
   0xa   : > { %p3051_p5 = por %p135_p2, %p134_p0  ;;  %p3055_p6 = por %p141_p4, %p140_p3 }
   0xb   : > { %p2359_p7 = scmp.ge.s32.totalorder %s2973_s18, 1  ;;  %p148_p8 = scmp.lt.s32.totalorder %s2973_s18, 3 }
   0xc   : > { %s3577_s26 = scalar_select %p3055_p6, 1, 0 }
   0xd   : > { %p2812_p9 = scmp.eq.s32.totalorder %s3034_s19, 0  ;;  %p3062_p10 = pnand %p2359_p7, %p148_p8 }
   0xe   : > { %s2975_s28 = smov [#allocation2]  }
   0xf   : > { %s160_s29 = sshll.u32 %s2975_s28, 4  ;;  %p2804_p11 = pneg %p3062_p10  ;;  %s161_s29 = int_to_ptr.vmem [resolvable:$true] %s160_s29 }
  0x10   : > { %s2894_s30 = scalar_lea.vmem %s161_s29, 4608  ;;  %p2902_p3 = scmp.lt.s32.totalorder %s161_s29, %s161_s29 }
  0x11   : > { %p2805_p12 = pnand %p2812_p9, %p2804_p11  ;;  %p2895_p0 = scmp.ne.s32.totalorder %s161_s29, %s2894_s30 }
  0x12   : > { %p2903_p4 = scmp.lt.s32.totalorder %s2894_s30, %s2894_s30 }
  0x13   : > { %p2885_p13 = pneg %p2805_p12 }
  0x14   : > { %p2904_p6 = por %p2903_p4, %p2902_p3 }
  0x15   : > { %p2897_p1 = pnand %p2895_p0, %p2885_p13 }
  0x17   : > { %p2898_p2 = pneg %p2897_p1 }
  0x19   : > { %p2905_p7 = pnand %p2904_p6, %p2898_p2 }
  0x1b   : > { %2908 = shalt.err (!%p2905_p7)
}
  0x1c   : > { %s2976_s5 = smov 128   ;;  %s2977_s6 = smov 8  }
  0x1d   : > { %2807 = dma.hbm_to_vmem [thread:$0]  (!%p2805_p12), %s3574_s3, 4608, %s161_s29, [#allocation3], %s2976_s5, %s2976_s5, %s2977_s6  }
  0x1e   : > { %200 = sbr.rel (%p3062_p10) target bundleno = 3047 (0xbe7), region = 36 }
  0x23   : > { %2952 = dma.done.wait (%p2812_p9), [#allocation3], 4608  }
  0x24   : > { %2954 = vsyncadd (%p2812_p9), [#allocation3], 4294962688  ;;  %p236_p8 = scmp.lt.s32.totalorder %s3034_s19, 1  ;;  %vm305_vm0 = vcmask 130048   ;;  %v252_v0 = vld [vmem:[#allocation2 + $0x8] sm:$0xff]  ;;  %v251_v1 = vld [vmem:[#allocation2] sm:$0xff] }
  0x25   : > { %2550 = vmatprep.subr.mxu0 %v252_v0  ;;  %v256_v6 = vld [vmem:[#allocation2 + $0x28] sm:$0xff]  ;;  %v255_v7 = vld [vmem:[#allocation2 + $0x20] sm:$0xff]  ;;  %v254_v8 = vld [vmem:[#allocation2 + $0x18] sm:$0xff]  ;;  %vm415_vm1 = vcmask 261120   ;;  %v2978_v52 = vmov 1.0   ;;  %s2979_s23 = smov 64  }
  0x26   : > { %s3081_s9 = scalar_select %p236_p8, %s3034_s19, 1  ;;  %2551 = vmatpush3.msra.mxu0 %v252_v0  ;;  %2560 = vmatprep.subr.mxu1 %v256_v6  ;;  %v253_v9 = vld [vmem:[#allocation2 + $0x10] sm:$0xff]  ;;  %v3089_v10 = vld [vmem:[#allocation2 + $0xe8] sm:$0xff]  ;;  %v3091_v11 = vld [vmem:[#allocation2 + $0xe0] sm:$0xff]  ;;  %vm1220_vm14 = vcmask 257024   ;;  %vm1479_vm15 = vcmask 1041409  }
  0x27   : > { %2552 = vmatprep.subr.mxu0 %v251_v1  ;;  %2561 = vmatpush3.msra.mxu1 %v256_v6  ;;  %v3095_v12 = vld [vmem:[#allocation2 + $0xd8] sm:$0xff]  ;;  %v3099_v13 = vld [vmem:[#allocation2 + $0xd0] sm:$0xff]  ;;  %v3103_v14 = vld [vmem:[#allocation2 + $0xc8] sm:$0xff]  ;;  %s2980_s27 = smov 96   ;;  %s2981_s28 = smov 32  }
  0x28   : > { %s2411_s10 = sshll.u32 %s3081_s9, 5  ;;  %2553 = vmatpush3.msra.mxu0 %v251_v1  ;;  %2562 = vmatprep.subr.mxu1 %v255_v7  ;;  %v3107_v15 = vld [vmem:[#allocation2 + $0xc0] sm:$0xff]  ;;  %v3111_v16 = vld [vmem:[#allocation2 + $0xb8] sm:$0xff]  ;;  %v3115_v17 = vld [vmem:[#allocation2 + $0xb0] sm:$0xff]  ;;  %s2413_s29 = sshll.u32 %s3081_s9, 4 }
  0x29   : > { %s240_s13 = scalar_lea.vmem %s3571_s0, %s2411_s10  ;;  %2563 = vmatpush3.msra.mxu1 %v255_v7  ;;  %2574 = vmatprep.subr.mxu0 %v3089_v10  ;;  %v3119_v18 = vld [vmem:[#allocation2 + $0xa8] sm:$0xff]  ;;  %v3123_v19 = vld [vmem:[#allocation2 + $0xa0] sm:$0xff]  ;;  %v3127_v20 = vld [vmem:[#allocation2 + $0x98] sm:$0xff]  ;;  %s245_s22 = scalar_lea.vmem %s3572_s1, %s2411_s10 }
  0x2a   : > { %v293_v2 = vld [vmem:[%s240_s13] sm:$0xff]  ;;  %v294_v3 = vld [vmem:[%s240_s13 + $0x8] sm:$0xff]  ;;  %v295_v4 = vld [vmem:[%s240_s13 + $0x10] sm:$0xff]  ;;  %2564 = vmatprep.subr.mxu1 %v254_v8  ;;  %s250_s6 = scalar_lea.vmem %s3573_s2, %s2413_s29  ;;  %s233_s7 = sand.u32 1, %s2965_s16  }
  0x2b   : > { %2554 = vmatprep.mubr.msk.f32.mxu0 %vm305_vm0, %v293_v2  ;;  %v296_v5 = vld [vmem:[%s240_s13 + $0x18] sm:$0xff]  ;;  %2565 = vmatpush3.msra.mxu1 %v254_v8  ;;  %v3131_v21 = vld [vmem:[#allocation2 + $0x90] sm:$0xff]  ;;  %v3135_v22 = vld [vmem:[#allocation2 + $0x88] sm:$0xff]  ;;  %s2364_s8 = sshll.u32 %s233_s7, 4  ;;  %s2414_s11 = sshll.u32 %s3034_s19, 8 }
  0x2c   : > { %2555 = vmatmul.mubr.msk.f32.vlgmr.msra.gmra.mxu0 %vm305_vm0, %v294_v3  ;;  %2566 = vmatprep.subr.mxu1 %v253_v9  ;;  %v2371_v23 = vld [vmem:[#allocation2 + $0x118] ss:$0 sm:$0xff]  ;;  %v3145_v40 = vld [vmem:[#allocation2 + $0x80] sm:$0xff]  ;;  %v3153_v42 = vld [vmem:[#allocation2 + $0x70] sm:$0xff]  ;;  %s235_s9 = scalar_lea.vmem [#allocation5], %s2364_s8  ;;  %s3529_s14 = scalar_lea.hbm %s3575_s4, %s2414_s11 }
  0x2d   : > { %2557 = vmatprep.mubr.msk.f32.mxu0 %vm305_vm0, %v295_v4  ;;  %2567 = vmatpush3.msra.mxu1 %v253_v9  ;;  %v3149_v41 = vld [vmem:[#allocation2 + $0x78] sm:$0xff]  ;;  %v284_v55 = vld [vmem:[#allocation2 + $0x108] sm:$0xff]  ;;  %v283_v57 = vld [vmem:[#allocation2 + $0x100] sm:$0xff]  ;;  %s2260_s10 = sshll.u32 %s235_s9, 4  ;;  %s3531_s20 = scalar_lea.sflag [#allocation4], %s233_s7  ;;  %s3524_s10 = int_to_ptr.vmem [resolvable:$true] %s2260_s10 }
  0x2e   : > { %2575 = vmatpush3.msra.mxu0 %v3089_v10  ;;  %v2381_v44 = vld [vmem:[#allocation2 + $0x11a] ss:$0 sm:$0xff]  ;;  %v281_v62 = vld [vmem:[#allocation2 + $0xf0] sm:$0xff]  ;;  %v297_v1 = vld [vmem:[%s245_s22] sm:$0xff]  ;;  %s2985_s19 = smov [#allocation5]  }
  0x2f   : > { %2576 = vmatprep.subr.mxu0 %v3091_v11  ;;  %v282_v59 = vld [vmem:[#allocation2 + $0xf8] sm:$0xff]  ;;  %v298_v2 = vld [vmem:[%s245_s22 + $0x8] sm:$0xff]  ;;  %v299_v3 = vld [vmem:[%s245_s22 + $0x10] sm:$0xff] }
  0x30   : > { %2558 = vmatmul.mubr.msk.f32.gmra.mxu0 %vm305_vm0, %v296_v5  ;;  %v300_v4 = vld [vmem:[%s245_s22 + $0x18] sm:$0xff]  ;;  %vm1481_vm0 = vcmask 1042434   ;;  %s2909_s22 = scalar_lea.vmem %s3524_s10, 256 }
  0x31   : > { %2577 = vmatpush3.msra.mxu0 %v3091_v11  ;;  %v2380_v5 = vld [vmem:[#allocation2 + $0x11b] ss:$0 sm:$0xff]  ;;  %p2910_p6 = scmp.ne.s32.totalorder %s3524_s10, %s2909_s22 }
  0x32   : > { %2578 = vmatprep.subr.mxu0 %v3095_v12 }
  0x33   : > { %2579 = vmatpush3.msra.mxu0 %v3095_v12  ;;  %p2911_p9 = pnand %p2910_p6, %p3051_p5 }
  0x34   : > { %2580 = vmatprep.subr.mxu0 %v3099_v13 }
  0x35   : > { %2581 = vmatpush3.msra.mxu0 %v3099_v13  ;;  %p2912_p10 = pneg %p2911_p9 }
  0x36   : > { %2582 = vmatprep.subr.mxu0 %v3103_v14 }
  0x37   : > { %2583 = vmatpush3.msra.mxu0 %v3103_v14 }
  0x38   : > { %2584 = vmatprep.subr.mxu0 %v3107_v15 }
  0x39   : > { %2585 = vmatpush3.msra.mxu0 %v3107_v15 }
  0x3a   : > { %2586 = vmatprep.subr.mxu0 %v3111_v16 }
  0x3b   : > { %2587 = vmatpush3.msra.mxu0 %v3111_v16 }
  0x3c   : > { %2588 = vmatprep.subr.mxu0 %v3115_v17 }
  0x3d   : > { %2589 = vmatpush3.msra.mxu0 %v3115_v17 }
  0x3e   : > { %2590 = vmatprep.subr.mxu0 %v3119_v18 }
  0x3f   : > { %2591 = vmatpush3.msra.mxu0 %v3119_v18 }
  0x40   : > { %2592 = vmatprep.subr.mxu0 %v3123_v19 }
  0x41   : > { %2593 = vmatpush3.msra.mxu0 %v3123_v19 }
  0x42   : > { %2594 = vmatprep.subr.mxu0 %v3127_v20 }
  0x43   : > { %2595 = vmatpush3.msra.mxu0 %v3127_v20 }
  0x44   : > { %2596 = vmatprep.subr.mxu0 %v3131_v21 }
  0x45   : > { %2597 = vmatpush3.msra.mxu0 %v3131_v21 }
  0x46   : > { %2598 = vmatprep.subr.mxu0 %v3135_v22 }
  0x47   : > { %2599 = vmatpush3.msra.mxu0 %v3135_v22 }
  0x48   : > { %2600 = vmatprep.subr.mxu0 %v3145_v40 }
  0x49   : > { %2601 = vmatpush3.msra.mxu0 %v3145_v40 }
  0x4a   : > { %2602 = vmatprep.subr.mxu0 %v3149_v41 }
  0x4b   : > { %2603 = vmatpush3.msra.mxu0 %v3149_v41 }
  0x4c   : > { %2604 = vmatprep.subr.mxu0 %v3153_v42 }
  0x4d   : > { %2605 = vmatpush3.msra.mxu0 %v3153_v42 }
  0xec   : > { %v2556_v24 = vpop.f32.mrf.mxu0 }
  0xed   : > { %v390_v25 = vadd.f32 %v2556_v24, %v2371_v23 }
  0xee   : > { %v384_v26 = vpop.f32.mrf.mxu0 }
  0xef   : > { %v385_v27 = vadd.f32 %v2371_v23, %v384_v26  ;;  %v408_v28 = vmul.f32 0.1, %v390_v25  ;;  %vm404_vm2 = vcmp.gt.f32.partialorder %v390_v25, 0.0 }
  0xf0   : > { %v2559_v29 = vpop.f32.mrf.mxu0 }
  0xf1   : > { %v400_v30 = vadd.f32 %v2559_v29, %v2371_v23  ;;  %vm403_vm3 = vcmp.gt.f32.partialorder %v385_v27, 0.0  ;;  %v407_v31 = vmul.f32 0.1, %v385_v27  ;;  %v412_v36 = vsel %vm404_vm2, %v390_v25, %v408_v28 }
  0xf2   : > { %v394_v32 = vpop.f32.mrf.mxu0  ;;  %vm1483_vm2 = vcmask 1043459  }
  0xf3   : > { %v395_v33 = vadd.f32 %v2371_v23, %v394_v32  ;;  %v411_v34 = vsel %vm403_vm3, %v385_v27, %v407_v31  ;;  %v410_v35 = vmul.f32 0.1, %v400_v30  ;;  %vm406_vm4 = vcmp.gt.f32.partialorder %v400_v30, 0.0 }
  0xf4   : > { %2568 = vmatprep.mubr.msk.f32.mxu1 %vm415_vm1, %v411_v34  ;;  %vm1485_vm3 = vcmask 1044484  }
  0xf5   : > { %vm405_vm5 = vcmp.gt.f32.partialorder %v395_v33, 0.0  ;;  %v409_v37 = vmul.f32 0.1, %v395_v33  ;;  %2569 = vmatmul.mubr.msk.f32.vlgmr.msra.gmra.mxu1 %vm415_vm1, %v412_v36  ;;  %v414_v39 = vsel %vm406_vm4, %v400_v30, %v410_v35  ;;  %vm1487_vm4 = vcmask 1045509  }
  0xf7   : > { %v413_v38 = vsel %vm405_vm5, %v395_v33, %v409_v37  ;;  %vm1489_vm5 = vcmask 1046534  }
  0xf8   : > { %2571 = vmatprep.mubr.msk.f32.mxu1 %vm415_vm1, %v413_v38 }
  0xf9   : > { %2572 = vmatmul.mubr.msk.f32.gmra.mxu1 %vm415_vm1, %v414_v39 }
  0xfa   : > { %2620 = vmatprep.mubr.msk.f32.mxu1 %vm415_vm1, %v2978_v52 }
 0x1b5   : > { %v3157_v43 = vpop.f32.mrf.mxu1 }
 0x1b6   : > { %v526_v48 = vmul.f32 %v3157_v43, %v2381_v44  ;;  %v518_v7 = vmul.f32 %v3157_v43, %v2380_v5 }
 0x1b7   : > { %v3159_v45 = vpop.f32.mrf.mxu1 }
 0x1b8   : > { %v525_v46 = vmul.f32 %v2381_v44, %v3159_v45  ;;  %v517_v6 = vmul.f32 %v2380_v5, %v3159_v45 }
 0x1b9   : > { %v3162_v47 = vpop.f32.mrf.mxu1 }
 0x1ba   : > { %2606 = vmatprep.mubr.f32.mxu0 %v525_v46  ;;  %v528_v51 = vmul.f32 %v3162_v47, %v2381_v44  ;;  %v520_v9 = vmul.f32 %v3162_v47, %v2380_v5 }
 0x1bb   : > { %v3165_v49 = vpop.f32.mrf.mxu1  ;;  %2607 = vmatmul.mubr.f32.vlgmr.msra.gmra.mxu0 %v526_v48 }
 0x1bc   : > { %v527_v50 = vmul.f32 %v2381_v44, %v3165_v49  ;;  %v519_v8 = vmul.f32 %v2380_v5, %v3165_v49 }
 0x1be   : > { %2609 = vmatprep.mubr.f32.mxu0 %v527_v50 }
 0x1bf   : > { %2610 = vmatmul.mubr.f32.gmra.mxu0 %v528_v51 }
 0x27b   : > { %v2608_v53 = vpop.f32.mrf.mxu0 }
 0x27c   : > { %v615_v63 = vmul.f32 %v2608_v53, %v282_v59 }
 0x27d   : > { %v595_v54 = vpop.f32.mrf.mxu0 }
 0x27e   : > { %v614_v0 = vmul.f32 %v595_v54, %v281_v62 }
 0x27f   : > { %v2611_v56 = vpop.f32.mrf.mxu0 }
 0x280   : > { %v617_v58 = vmul.f32 %v2611_v56, %v284_v55 }
 0x281   : > { %v605_v60 = vpop.f32.mrf.mxu0 }
 0x282   : > { %v616_v61 = vmul.f32 %v605_v60, %v283_v57  ;;  %2612 = vmatprep.subr.mxu1 %v617_v58  ;;  %v953_v60 = vlaneseq }
 0x283   : > { %2613 = vmatpush3.msra.mxu1 %v617_v58  ;;  %v2982_v58 = vmov 1983009808  }
 0x284   : > { %2614 = vmatprep.subr.mxu1 %v616_v61 }
 0x285   : > { %2615 = vmatpush3.msra.mxu1 %v616_v61 }
 0x286   : > { %2616 = vmatprep.subr.mxu1 %v615_v63 }
 0x287   : > { %2617 = vmatpush3.msra.mxu1 %v615_v63 }
 0x288   : > { %2618 = vmatprep.subr.mxu1 %v614_v0 }
 0x289   : > { %2619 = vmatpush3.msra.mxu1 %v614_v0 }
 0x28a   : > { %2621 = vmatmul.mubr.msk.f32.vlgmr.msra.gmra.mxu1 %vm415_vm1, %v2978_v52  ;;  %2626 = vmatprep.subr.mxu1 %v284_v55 }
 0x28b   : > { %2627 = vmatpush3.msra.mxu1 %v284_v55  ;;  %2623 = vmatprep.mubr.msk.f32.mxu1 %vm415_vm1, %v2978_v52 }
 0x28c   : > { %2628 = vmatprep.subr.mxu1 %v283_v57 }
 0x28d   : > { %2629 = vmatpush3.msra.mxu1 %v283_v57 }
 0x28e   : > { %2624 = vmatmul.mubr.msk.f32.gmra.mxu1 %vm415_vm1, %v2978_v52  ;;  %2630 = vmatprep.subr.mxu1 %v282_v59 }
 0x28f   : > { %2631 = vmatpush3.msra.mxu1 %v282_v59  ;;  %2634 = vmatprep.mubr.msk.f32.mxu1 %vm415_vm1, %v297_v1  ;;  %v951_v59 = vunpack.c.l.s4 %v2982_v58  ;;  %v2983_v1 = vmov 1934713408  }
 0x290   : > { %2632 = vmatprep.subr.mxu1 %v281_v62 }
 0x291   : > { %2633 = vmatpush3.msra.mxu1 %v281_v62  ;;  %v952_v61 = vunpack.c.0.s8 %v951_v59  ;;  %v3251_v62 = vshrl.u32 %v953_v60, 7 }
 0x292   : > { %2635 = vmatmul.mubr.msk.f32.vlgmr.msra.gmra.mxu1 %vm415_vm1, %v298_v2  ;;  %2640 = vmatprep.subr.mxu1 %v3089_v10  ;;  %v983_v2 = vunpack.c.l.s4 %v2983_v1 }
 0x293   : > { %2641 = vmatpush3.msra.mxu1 %v3089_v10  ;;  %2637 = vmatprep.mubr.msk.f32.mxu1 %vm415_vm1, %v299_v3  ;;  %v3254_v3 = vsub.s32 %v952_v61, %v3251_v62 }
 0x294   : > { %2642 = vmatprep.subr.mxu1 %v3091_v11 }
 0x295   : > { %2643 = vmatpush3.msra.mxu1 %v3091_v11 }
 0x296   : > { %2638 = vmatmul.mubr.msk.f32.gmra.mxu1 %vm415_vm1, %v300_v4  ;;  %2644 = vmatprep.subr.mxu1 %v3095_v12 }
 0x297   : > { %2645 = vmatpush3.msra.mxu1 %v3095_v12  ;;  %2672 = vmatprep.mubr.f32.mxu1 %v517_v6 }
 0x298   : > { %2646 = vmatprep.subr.mxu1 %v3099_v13 }
 0x299   : > { %2647 = vmatpush3.msra.mxu1 %v3099_v13 }
 0x29a   : > { %2648 = vmatprep.subr.mxu1 %v3103_v14 }
 0x29b   : > { %2649 = vmatpush3.msra.mxu1 %v3103_v14 }
 0x29c   : > { %2650 = vmatprep.subr.mxu1 %v3107_v15 }
 0x29d   : > { %2651 = vmatpush3.msra.mxu1 %v3107_v15 }
 0x29e   : > { %2652 = vmatprep.subr.mxu1 %v3111_v16 }
 0x29f   : > { %2653 = vmatpush3.msra.mxu1 %v3111_v16 }
 0x2a0   : > { %2654 = vmatprep.subr.mxu1 %v3115_v17 }
 0x2a1   : > { %2655 = vmatpush3.msra.mxu1 %v3115_v17 }
 0x2a2   : > { %2656 = vmatprep.subr.mxu1 %v3119_v18 }
 0x2a3   : > { %2657 = vmatpush3.msra.mxu1 %v3119_v18 }
 0x2a4   : > { %2658 = vmatprep.subr.mxu1 %v3123_v19 }
 0x2a5   : > { %2659 = vmatpush3.msra.mxu1 %v3123_v19 }
 0x2a6   : > { %2660 = vmatprep.subr.mxu1 %v3127_v20 }
 0x2a7   : > { %2661 = vmatpush3.msra.mxu1 %v3127_v20 }
 0x2a8   : > { %2662 = vmatprep.subr.mxu1 %v3131_v21 }
 0x2a9   : > { %2663 = vmatpush3.msra.mxu1 %v3131_v21 }
 0x2aa   : > { %2664 = vmatprep.subr.mxu1 %v3135_v22 }
 0x2ab   : > { %2665 = vmatpush3.msra.mxu1 %v3135_v22 }
 0x2ac   : > { %2666 = vmatprep.subr.mxu1 %v3145_v40 }
 0x2ad   : > { %2667 = vmatpush3.msra.mxu1 %v3145_v40 }
 0x2ae   : > { %2668 = vmatprep.subr.mxu1 %v3149_v41 }
 0x2af   : > { %2669 = vmatpush3.msra.mxu1 %v3149_v41 }
 0x2b0   : > { %2670 = vmatprep.subr.mxu1 %v3153_v42 }
 0x2b1   : > { %2671 = vmatpush3.msra.mxu1 %v3153_v42 }
 0x2b2   : > { %2673 = vmatmul.mubr.f32.vlgmr.msra.gmra.mxu1 %v518_v7 }
 0x2b3   : > { %2675 = vmatprep.mubr.f32.mxu1 %v519_v8  ;;  %v984_v8 = vunpack.c.0.s8 %v983_v2  ;;  %v2984_v2 = vmov 0.0  }
 0x2b6   : > { %2676 = vmatmul.mubr.f32.gmra.mxu1 %v520_v9 }
 0x34a   : > { %v2622_v23 = vpop.f32.mrf.mxu1 }
 0x34c   : > { %v687_v24 = vpop.f32.mrf.mxu1 }
 0x34e   : > { %v2625_v25 = vpop.f32.mrf.mxu1 }
 0x350   : > { %v697_v26 = vpop.f32.mrf.mxu1 }
 0x352   : > { %v2636_v27 = vpop.f32.mrf.mxu1 }
 0x353   : > { %vm901_vm7 = vcmp.gt.f32.partialorder %v2636_v27, 0.0 }
 0x354   : > { %v784_v28 = vpop.f32.mrf.mxu1 }
 0x355   : > { %vm900_vm9 = vcmp.gt.f32.partialorder %v784_v28, 0.0 }
 0x356   : > { %v2639_v29 = vpop.f32.mrf.mxu1 }
 0x357   : > { %vm903_vm12 = vcmp.gt.f32.partialorder %v2639_v29, 0.0 }
 0x358   : > { %v794_v30 = vpop.f32.mrf.mxu1 }
 0x359   : > { %vm902_vm13 = vcmp.gt.f32.partialorder %v794_v30, 0.0  ;;  %v3263_v30 = vsub.s32 %v984_v8, %v3251_v62 }
 0x372   : > { %v2674_v31 = vpop.f32.mrf.mxu1 }
 0x373   : > { %v875_v32 = vadd.f32 %v2674_v31, %v2622_v23 }
 0x374   : > { %v869_v33 = vpop.f32.mrf.mxu1 }
 0x375   : > { %vm889_vm6 = vcmp.gt.f32.partialorder %v875_v32, 0.0  ;;  %v893_v34 = vmul.f32 0.2, %v875_v32  ;;  %v870_v35 = vadd.f32 %v869_v33, %v687_v24 }
 0x376   : > { %v2677_v36 = vpop.f32.mrf.mxu1 }
 0x377   : > { %v897_v37 = vsel %vm889_vm6, %v875_v32, %v893_v34  ;;  %vm888_vm8 = vcmp.gt.f32.partialorder %v870_v35, 0.0  ;;  %v892_v38 = vmul.f32 0.2, %v870_v35  ;;  %v885_v46 = vadd.f32 %v2677_v36, %v2625_v25 }
 0x378   : > { %v3218_v39 = vsel %vm901_vm7, %v897_v37, -1e+30  ;;  %v879_v48 = vpop.f32.mrf.mxu1  ;;  %vm1491_vm6 = vcmask 1047559   ;;  %vm1518_vm7 = vcmask 31744  }
 0x379   : > { %v896_v44 = vsel %vm888_vm8, %v870_v35, %v892_v38  ;;  %926 = vrot.lane.b32.xlu0 %v3218_v39, %s2979_s23  ;;  %914 = vrot.lane.b32.xlu1 %v3218_v39, %s2980_s27  ;;  %v895_v51 = vmul.f32 0.2, %v885_v46  ;;  %v880_v52 = vadd.f32 %v879_v48, %v697_v26  ;;  %vm891_vm10 = vcmp.gt.f32.partialorder %v885_v46, 0.0 }
 0x37a   : > { %v3224_v50 = vsel %vm900_vm9, %v896_v44, -1e+30  ;;  %vm1523_vm8 = vcmask 64512  }
 0x37b   : > { %v899_v53 = vsel %vm891_vm10, %v885_v46, %v895_v51  ;;  %v894_v54 = vmul.f32 0.2, %v880_v52  ;;  %vm890_vm11 = vcmp.gt.f32.partialorder %v880_v52, 0.0 }
 0x37c   : > { %v3234_v55 = vsel %vm903_vm12, %v899_v53, -1e+30 }
 0x37d   : > { %938 = vrot.lane.b32.xlu1 %v3218_v39, %s2981_s28  ;;  %912 = vrot.lane.b32.xlu0 %v3224_v50, %s2980_s27  ;;  %v898_v56 = vsel %vm890_vm11, %v880_v52, %v894_v54 }
 0x37e   : > { %v3240_v57 = vsel %vm902_vm13, %v898_v56, -1e+30 }
 0x381   : > { %936 = vrot.lane.b32.xlu1 %v3224_v50, %s2981_s28  ;;  %924 = vrot.lane.b32.xlu0 %v3224_v50, %s2979_s23 }
 0x385   : > { %930 = vrot.lane.b32.xlu0 %v3234_v55, %s2979_s23  ;;  %918 = vrot.lane.b32.xlu1 %v3234_v55, %s2980_s27 }
 0x389   : > { %928 = vrot.lane.b32.xlu1 %v3240_v57, %s2979_s23  ;;  %916 = vrot.lane.b32.xlu0 %v3240_v57, %s2980_s27 }
 0x38d   : > { %942 = vrot.lane.b32.xlu1 %v3234_v55, %s2981_s28  ;;  %940 = vrot.lane.b32.xlu0 %v3240_v57, %s2981_s28 }
 0x3eb   : > { %v927_v63 = vpop.permute.xlu0 %926  ;;  %v915_v0 = vpop.permute.xlu1 %914 }
 0x3ec   : > { %v1016_v4 = vcombine.low %v3218_v39, %v927_v63  ;;  %v1017_v5 = vcombine.high %v3218_v39, %v927_v63 }
 0x3ee   : > { %v1024_v26 = vrot.slane %v1016_v4, %v3254_v3  ;;  %v1031_v27 = vrot.slane %v1017_v5, %v3254_v3 }
 0x3ef   : > { %v939_v6 = vpop.permute.xlu1 %938  ;;  %v913_v7 = vpop.permute.xlu0 %912 }
 0x3f0   : > { %v1032_v9 = vcombine.low %v915_v0, %v939_v6  ;;  %v1033_v23 = vcombine.high %v915_v0, %v939_v6 }
 0x3f2   : > { %v1040_v24 = vrot.slane %v1032_v9, %v3254_v3  ;;  %v1047_v25 = vrot.slane %v1033_v23, %v3254_v3 }
 0x3f3   : > { %v937_v28 = vpop.permute.xlu1 %936  ;;  %v925_v29 = vpop.permute.xlu0 %924 }
 0x3f4   : > { %v964_v31 = vcombine.low %v913_v7, %v937_v28  ;;  %v948_v32 = vcombine.low %v3224_v50, %v925_v29  ;;  %v1049_v33 = vcombine.high %v1024_v26, %v1040_v24  ;;  %v1048_v34 = vcombine.low %v1024_v26, %v1040_v24 }
 0x3f5   : > { %v1064_v35 = vcombine.low %v1031_v27, %v1047_v25  ;;  %v1065_v36 = vcombine.high %v1031_v27, %v1047_v25  ;;  %v965_v51 = vcombine.high %v913_v7, %v937_v28  ;;  %v949_v58 = vcombine.high %v3224_v50, %v925_v29 }
 0x3f6   : > { %v972_v37 = vrot.slane %v964_v31, %v3254_v3  ;;  %v956_v38 = vrot.slane %v948_v32, %v3254_v3  ;;  %v1063_v46 = vrot.slane %v1049_v33, %v3263_v30  ;;  %v1056_v48 = vrot.slane %v1048_v34, %v3263_v30 }
 0x3f7   : > { %v3268_v44 = vpop.permute.xlu1 %918  ;;  %v1072_v54 = vrot.slane %v1064_v35, %v3263_v30  ;;  %v1079_v56 = vrot.slane %v1065_v36, %v3263_v30  ;;  %v979_v63 = vrot.slane %v965_v51, %v3254_v3  ;;  %v963_v5 = vrot.slane %v949_v58, %v3254_v3  ;;  %v931_v8 = vpop.permute.xlu0 %930 }
 0x3f8   : > { %v1251_v52 = vsel %vm1220_vm14, %v1063_v46, -inf  ;;  %v1245_v53 = vsel %vm1220_vm14, %v1056_v48, -inf  ;;  %v980_v59 = vcombine.low %v956_v38, %v972_v37  ;;  %v1080_v4 = vcombine.high %v1056_v48, %v2984_v2 }
 0x3f9   : > { %1252 = vmax.xlane.f32.xlu1 %v1251_v52  ;;  %1246 = vmax.xlane.f32.xlu0 %v1245_v53  ;;  %v1257_v0 = vsel %vm1220_vm14, %v1072_v54, -inf  ;;  %v1263_v1 = vsel %vm1220_vm14, %v1079_v56, -inf  ;;  %v981_v7 = vcombine.high %v956_v38, %v972_v37  ;;  %v1081_v23 = vcombine.high %v1063_v46, %v2984_v2 }
 0x3fa   : > { %v988_v6 = vrot.slane %v980_v59, %v3263_v30  ;;  %v1248_v9 = vsel %vm1220_vm14, %v1080_v4, -inf  ;;  %v996_v27 = vcombine.low %v963_v5, %v979_v63  ;;  %v1082_v32 = vcombine.high %v1072_v54, %v2984_v2 }
 0x3fb   : > { %v3277_v61 = vpop.permute.xlu1 %928  ;;  %v995_v26 = vrot.slane %v981_v7, %v3263_v30  ;;  %v917_v28 = vpop.permute.xlu0 %916  ;;  %v1254_v31 = vsel %vm1220_vm14, %v1081_v23, -inf  ;;  %v997_v35 = vcombine.high %v963_v5, %v979_v63  ;;  %v1152_v36 = vcombine.low %v3234_v55, %v931_v8 }
 0x3fc   : > { %v1221_v25 = vsel %vm1220_vm14, %v988_v6, -inf  ;;  %v1004_v34 = vrot.slane %v996_v27, %v3263_v30  ;;  %v1260_v38 = vsel %vm1220_vm14, %v1082_v32, -inf  ;;  %v1083_v46 = vcombine.high %v1079_v56, %v2984_v2 }
 0x3fd   : > { %1258 = vmax.xlane.f32.xlu1 %v1257_v0  ;;  %1264 = vmax.xlane.f32.xlu0 %v1263_v1  ;;  %v1227_v33 = vsel %vm1220_vm14, %v995_v26, -inf  ;;  %v1011_v51 = vrot.slane %v997_v35, %v3263_v30  ;;  %v1160_v52 = vrot.slane %v1152_v36, %v3254_v3  ;;  %v1012_v59 = vcombine.high %v988_v6, %v2984_v2 }
 0x3fe   : > { %v1233_v48 = vsel %vm1220_vm14, %v1004_v34, -inf  ;;  %v1266_v58 = vsel %vm1220_vm14, %v1083_v46, -inf  ;;  %v1013_v1 = vcombine.high %v995_v26, %v2984_v2  ;;  %v1153_v4 = vcombine.high %v3234_v55, %v931_v8 }
 0x3ff   : > { %v943_v24 = vpop.permute.xlu1 %942  ;;  %v941_v53 = vpop.permute.xlu0 %940  ;;  %v1239_v56 = vsel %vm1220_vm14, %v1011_v51, -inf  ;;  %v1084_v5 = vcombine.low %v3240_v57, %v3277_v61 }
 0x400   : > { %v1168_v29 = vcombine.low %v3268_v44, %v943_v24  ;;  %v1169_v54 = vcombine.high %v3268_v44, %v943_v24  ;;  %v1100_v0 = vcombine.low %v917_v28, %v941_v53  ;;  %v1224_v44 = vsel %vm1220_vm14, %v1012_v59, -inf }
 0x401   : > { %1249 = vmax.xlane.f32.xlu1 %v1248_v9  ;;  %1222 = vmax.xlane.f32.xlu0 %v1221_v25  ;;  %v1230_v23 = vsel %vm1220_vm14, %v1013_v1, -inf  ;;  %v1014_v24 = vcombine.high %v1004_v34, %v2984_v2  ;;  %v1167_v8 = vrot.slane %v1153_v4, %v3254_v3  ;;  %v1092_v26 = vrot.slane %v1084_v5, %v3254_v3 }
 0x402   : > { %v1176_v37 = vrot.slane %v1168_v29, %v3254_v3  ;;  %v3310_v7 = vrot.slane %v1169_v54, %v3254_v3  ;;  %v1108_v9 = vrot.slane %v1100_v0, %v3254_v3  ;;  %v1015_v29 = vcombine.high %v1011_v51, %v2984_v2 }
 0x403   : > { %v1236_v32 = vsel %vm1220_vm14, %v1014_v24, -inf  ;;  %v1085_v51 = vcombine.high %v3240_v57, %v3277_v61 }
 0x404   : > { %v1184_v63 = vcombine.low %v1160_v52, %v1176_v37  ;;  %v1185_v25 = vcombine.high %v1160_v52, %v1176_v37  ;;  %v1116_v35 = vcombine.low %v1092_v26, %v1108_v9  ;;  %v1242_v34 = vsel %vm1220_vm14, %v1015_v29, -inf }
 0x405   : > { %1255 = vmax.xlane.f32.xlu1 %v1254_v31  ;;  %1228 = vmax.xlane.f32.xlu0 %v1227_v33  ;;  %v1200_v31 = vcombine.low %v1167_v8, %v3310_v7  ;;  %v1101_v37 = vcombine.high %v917_v28, %v941_v53  ;;  %v1099_v53 = vrot.slane %v1085_v51, %v3254_v3 }
 0x406   : > { %v1192_v6 = vrot.slane %v1184_v63, %v3263_v30  ;;  %v1199_v33 = vrot.slane %v1185_v25, %v3263_v30  ;;  %v1124_v46 = vrot.slane %v1116_v35, %v3263_v30  ;;  %v1201_v25 = vcombine.high %v1167_v8, %v3310_v7 }
 0x407   : > { %v1208_v36 = vrot.slane %v1200_v31, %v3263_v30 }
 0x408   : > { %v1293_v27 = vsel %vm1220_vm14, %v1192_v6, -inf  ;;  %v1217_v54 = vcombine.high %v1199_v33, %v2984_v2  ;;  %v1269_v59 = vsel %vm1220_vm14, %v1124_v46, -inf  ;;  %v1148_v5 = vcombine.high %v1124_v46, %v2984_v2 }
 0x409   : > { %1261 = vmax.xlane.f32.xlu1 %v1260_v38  ;;  %1234 = vmax.xlane.f32.xlu0 %v1233_v48  ;;  %v1299_v38 = vsel %vm1220_vm14, %v1199_v33, -inf  ;;  %v1117_v48 = vcombine.high %v1092_v26, %v1108_v9  ;;  %v1305_v52 = vsel %vm1220_vm14, %v1208_v36, -inf  ;;  %v1218_v0 = vcombine.high %v1208_v36, %v2984_v2 }
 0x40a   : > { %v1302_v63 = vsel %vm1220_vm14, %v1217_v54, -inf  ;;  %v1215_v31 = vrot.slane %v1201_v25, %v3263_v30 }
 0x40b   : > { %v1131_v28 = vrot.slane %v1117_v48, %v3263_v30  ;;  %v1308_v4 = vsel %vm1220_vm14, %v1218_v0, -inf }
 0x40c   : > { %v1311_v35 = vsel %vm1220_vm14, %v1215_v31, -inf  ;;  %v1219_v36 = vcombine.high %v1215_v31, %v2984_v2 }
 0x40d   : > { %1267 = vmax.xlane.f32.xlu1 %v1266_v58  ;;  %1240 = vmax.xlane.f32.xlu0 %v1239_v56  ;;  %v1115_v58 = vrot.slane %v1101_v37, %v3254_v3  ;;  %v1275_v61 = vsel %vm1220_vm14, %v1131_v28, -inf  ;;  %v1216_v56 = vcombine.high %v1192_v6, %v2984_v2  ;;  %v1272_v6 = vsel %vm1220_vm14, %v1148_v5, -inf }
 0x40e   : > { %v1149_v24 = vcombine.high %v1131_v28, %v2984_v2 }
 0x40f   : > { %v1132_v1 = vcombine.low %v1099_v53, %v1115_v58  ;;  %v1296_v9 = vsel %vm1220_vm14, %v1216_v56, -inf }
 0x410   : > { %v1278_v29 = vsel %vm1220_vm14, %v1149_v24, -inf }
 0x411   : > { %1225 = vmax.xlane.f32.xlu1 %v1224_v44  ;;  %1231 = vmax.xlane.f32.xlu0 %v1230_v23  ;;  %v285_v44 = vld [vmem:[#allocation2 + $0x110] sm:$0xff]  ;;  %v1140_v3 = vrot.slane %v1132_v1, %v3263_v30  ;;  %v1133_v23 = vcombine.high %v1099_v53, %v1115_v58 }
 0x412   : > { %2678 = vmatprep.subr.mxu0 %v285_v44 }
 0x413   : > { %2679 = vmatpush3.msra.mxu0 %v285_v44  ;;  %v1281_v26 = vsel %vm1220_vm14, %v1140_v3, -inf  ;;  %v1150_v33 = vcombine.high %v1140_v3, %v2984_v2 }
 0x414   : > { %2686 = vmatprep.subr.mxu0 %v3089_v10 }
 0x415   : > { %1294 = vmax.xlane.f32.xlu1 %v1293_v27  ;;  %1237 = vmax.xlane.f32.xlu0 %v1236_v32  ;;  %v1147_v27 = vrot.slane %v1133_v23, %v3263_v30  ;;  %v1284_v7 = vsel %vm1220_vm14, %v1150_v33, -inf  ;;  %v1314_v30 = vsel %vm1220_vm14, %v1219_v36, -inf }
 0x417   : > { %v1287_v32 = vsel %vm1220_vm14, %v1147_v27, -inf  ;;  %v1151_v8 = vcombine.high %v1147_v27, %v2984_v2 }
 0x419   : > { %1243 = vmax.xlane.f32.xlu1 %v1242_v34  ;;  %1300 = vmax.xlane.f32.xlu0 %v1299_v38  ;;  %v1290_v34 = vsel %vm1220_vm14, %v1151_v8, -inf }
 0x41d   : > { %1306 = vmax.xlane.f32.xlu1 %v1305_v52  ;;  %1270 = vmax.xlane.f32.xlu0 %v1269_v59  ;;  %v1350_v52 = vand.u32 127, %v953_v60 }
 0x41f   : > { %v3386_v59 = vsub.s32 %v1350_v52, %v3251_v62 }
 0x421   : > { %1303 = vmax.xlane.f32.xlu1 %v1302_v63  ;;  %1276 = vmax.xlane.f32.xlu0 %v1275_v61 }
 0x425   : > { %1309 = vmax.xlane.f32.xlu1 %v1308_v4  ;;  %1297 = vmax.xlane.f32.xlu0 %v1296_v9 }
 0x429   : > { %1273 = vmax.xlane.f32.xlu1 %v1272_v6  ;;  %1282 = vmax.xlane.f32.xlu0 %v1281_v26 }
 0x42d   : > { %1279 = vmax.xlane.f32.xlu1 %v1278_v29  ;;  %1288 = vmax.xlane.f32.xlu0 %v1287_v32 }
 0x431   : > { %1312 = vmax.xlane.f32.xlu1 %v1311_v35  ;;  %1285 = vmax.xlane.f32.xlu0 %v1284_v7 }
 0x435   : > { %1291 = vmax.xlane.f32.xlu0 %v1290_v34 }
 0x439   : > { %1315 = vmax.xlane.f32.xlu0 %v1314_v30 }
 0x442   : > { %1772 = vrot.lane.b32.xlu1 %v3162_v47, %s2981_s28 }
 0x446   : > { %1768 = vrot.lane.b32.xlu1 %v3157_v43, %s2981_s28 }
 0x44a   : > { %1766 = vrot.lane.b32.xlu1 %v3159_v45, %s2981_s28 }
 0x44e   : > { %1758 = vrot.lane.b32.xlu1 %v3165_v49, %s2979_s23 }
 0x44f   : > { %1770 = vrot.lane.b32.xlu0 %v3165_v49, %s2981_s28 }
 0x452   : > { %1754 = vrot.lane.b32.xlu1 %v3159_v45, %s2979_s23 }
 0x453   : > { %1760 = vrot.lane.b32.xlu0 %v3162_v47, %s2979_s23 }
 0x456   : > { %1746 = vrot.lane.b32.xlu1 %v3165_v49, %s2980_s27 }
 0x457   : > { %1756 = vrot.lane.b32.xlu0 %v3157_v43, %s2979_s23  ;;  %s2913_s23 = sshll.u32 %s2985_s19, 4  ;;  %s2914_s23 = int_to_ptr.vmem [resolvable:$false] %s2913_s23 }
 0x458   : > { %p2916_p11 = scmp.lt.s32.totalorder %s3524_s10, %s2914_s23 }
 0x45a   : > { %1742 = vrot.lane.b32.xlu1 %v3159_v45, %s2980_s27 }
 0x45b   : > { %1748 = vrot.lane.b32.xlu0 %v3162_v47, %s2980_s27 }
 0x45f   : > { %1744 = vrot.lane.b32.xlu0 %v3157_v43, %s2980_s27  ;;  %s2915_s27 = scalar_lea.vmem %s2914_s23, 512 }
 0x460   : > { %p2917_p12 = scmp.lt.s32.totalorder %s2915_s27, %s2909_s22 }
 0x462   : > { %p2918_p13 = por %p2917_p12, %p2916_p11 }
 0x464   : > { %p2919_p0 = pnand %p2918_p13, %p2912_p10 }
 0x482   : > { %v1253_v2 = vpop.xlane.xlu1 %1252  ;;  %v1247_v37 = vpop.xlane.xlu0 %1246 }
 0x483   : > { %v1386_v0 = vrot.slane %v1247_v37, %v3386_v59  ;;  %v1394_v60 = vrot.slane %v1253_v2, %v3386_v59 }
 0x486   : > { %v1259_v38 = vpop.xlane.xlu1 %1258  ;;  %v1265_v46 = vpop.xlane.xlu0 %1264 }
 0x487   : > { %v1402_v26 = vrot.slane %v1259_v38, %v3386_v59  ;;  %v1410_v37 = vrot.slane %v1265_v46, %v3386_v59 }
 0x48a   : > { %v1250_v48 = vpop.xlane.xlu1 %1249  ;;  %v1223_v51 = vpop.xlane.xlu0 %1222 }
 0x48b   : > { %v1390_v63 = vrot.slane %v1250_v48, %v3386_v59  ;;  %v1354_v44 = vrot.slane %v1223_v51, %v3386_v59 }
 0x48d   : > { %v1493_v1 = vsel %vm1479_vm15, %v1390_v63, %v1386_v0 }
 0x48e   : > { %v1256_v54 = vpop.xlane.xlu1 %1255  ;;  %v1229_v58 = vpop.xlane.xlu0 %1228  ;;  %v1494_v9 = vsel %vm1481_vm0, %v1394_v60, %v1493_v1 }
 0x48f   : > { %v1398_v4 = vrot.slane %v1256_v54, %v3386_v59  ;;  %v1362_v24 = vrot.slane %v1229_v58, %v3386_v59 }
 0x491   : > { %v1495_v6 = vsel %vm1483_vm2, %v1398_v4, %v1494_v9 }
 0x492   : > { %v1262_v28 = vpop.xlane.xlu1 %1261  ;;  %v1235_v53 = vpop.xlane.xlu0 %1234  ;;  %v1496_v35 = vsel %vm1485_vm3, %v1402_v26, %v1495_v6 }
 0x493   : > { %v1406_v25 = vrot.slane %v1262_v28, %v3386_v59  ;;  %v1370_v31 = vrot.slane %v1235_v53, %v3386_v59 }
 0x495   : > { %v1497_v34 = vsel %vm1487_vm4, %v1406_v25, %v1496_v35 }
 0x496   : > { %v1268_v61 = vpop.xlane.xlu1 %1267  ;;  %v1241_v56 = vpop.xlane.xlu0 %1240  ;;  %v1498_v52 = vsel %vm1489_vm5, %v1410_v37, %v1497_v34 }
 0x497   : > { %v1414_v36 = vrot.slane %v1268_v61, %v3386_v59  ;;  %v1378_v38 = vrot.slane %v1241_v56, %v3386_v59 }
 0x499   : > { %v1499_v28 = vsel %vm1491_vm6, %v1414_v36, %v1498_v52 }
 0x49a   : > { %v1226_v5 = vpop.xlane.xlu1 %1225  ;;  %v1232_v23 = vpop.xlane.xlu0 %1231  ;;  %v1520_v61 = vsel %vm1518_vm7, %v1499_v28, 0.0 }
 0x49b   : > { %v1358_v3 = vrot.slane %v1226_v5, %v3386_v59  ;;  %v1366_v29 = vrot.slane %v1232_v23, %v3386_v59 }
 0x49d   : > { %v1480_v27 = vsel %vm1479_vm15, %v1358_v3, %v1354_v44 }
 0x49e   : > { %v1482_v32 = vsel %vm1481_vm0, %v1362_v24, %v1480_v27  ;;  %v1295_v33 = vpop.xlane.xlu1 %1294  ;;  %v1238_v8 = vpop.xlane.xlu0 %1237 }
 0x49f   : > { %v1484_v7 = vsel %vm1483_vm2, %v1366_v29, %v1482_v32  ;;  %v1374_v2 = vrot.slane %v1238_v8, %v3386_v59 }
 0x4a0   : > { %v1486_v30 = vsel %vm1485_vm3, %v1370_v31, %v1484_v7 }
 0x4a1   : > { %v1488_v48 = vsel %vm1487_vm4, %v1374_v2, %v1486_v30 }
 0x4a2   : > { %v1244_v51 = vpop.xlane.xlu1 %1243  ;;  %v1301_v58 = vpop.xlane.xlu0 %1300  ;;  %v1490_v53 = vsel %vm1489_vm5, %v1378_v38, %v1488_v48 }
 0x4a3   : > { %v1382_v54 = vrot.slane %v1244_v51, %v3386_v59 }
 0x4a5   : > { %v1492_v63 = vsel %vm1491_vm6, %v1382_v54, %v1490_v53 }
 0x4a6   : > { %v3418_v46 = vpop.xlane.xlu1 %1306  ;;  %v1519_v0 = vsel %vm1518_vm7, %v1492_v63, 0.0  ;;  %v1271_v56 = vpop.xlane.xlu0 %1270 }
 0x4a7   : > { %2680 = vmatprep.mubr.msk.f32.mxu0 %vm1523_vm8, %v1519_v0 }
 0x4a8   : > { %2681 = vmatmul.mubr.msk.f32.vlgmr.msra.gmra.mxu0 %vm1523_vm8, %v1520_v61 }
 0x4a9   : > { %2687 = vmatpush3.msra.mxu0 %v3089_v10 }
 0x4aa   : > { %v1304_v1 = vpop.xlane.xlu1 %1303  ;;  %2688 = vmatprep.subr.mxu0 %v3091_v11  ;;  %v1277_v4 = vpop.xlane.xlu0 %1276 }
 0x4ab   : > { %2689 = vmatpush3.msra.mxu0 %v3091_v11  ;;  %v1426_v23 = vrot.slane %v1277_v4, %v3386_v59  ;;  %v1462_v32 = vrot.slane %v1304_v1, %v3386_v59 }
 0x4ac   : > { %2690 = vmatprep.subr.mxu0 %v3095_v12 }
 0x4ad   : > { %2691 = vmatpush3.msra.mxu0 %v3095_v12  ;;  %v1418_v12 = vrot.slane %v1271_v56, %v3386_v59 }
 0x4ae   : > { %v3429_v60 = vpop.xlane.xlu1 %1309  ;;  %2692 = vmatprep.subr.mxu0 %v3099_v13  ;;  %v1298_v5 = vpop.xlane.xlu0 %1297 }
 0x4af   : > { %2693 = vmatpush3.msra.mxu0 %v3099_v13  ;;  %v1454_v9 = vrot.slane %v1298_v5, %v3386_v59  ;;  %v1450_v13 = vrot.slane %v1295_v33, %v3386_v59  ;;  %v1470_v38 = vrot.slane %v3429_v60, %v3386_v59 }
 0x4b0   : > { %2694 = vmatprep.subr.mxu0 %v3103_v14 }
 0x4b1   : > { %2695 = vmatpush3.msra.mxu0 %v3103_v14  ;;  %v1507_v24 = vsel %vm1479_vm15, %v1454_v9, %v1450_v13 }
 0x4b2   : > { %v1274_v10 = vpop.xlane.xlu1 %1273  ;;  %2696 = vmatprep.subr.mxu0 %v3107_v15  ;;  %v1283_v44 = vpop.xlane.xlu0 %1282 }
 0x4b3   : > { %v1422_v11 = vrot.slane %v1274_v10, %v3386_v59  ;;  %2697 = vmatpush3.msra.mxu0 %v3107_v15  ;;  %v1434_v31 = vrot.slane %v1283_v44, %v3386_v59 }
 0x4b4   : > { %2698 = vmatprep.subr.mxu0 %v3111_v16 }
 0x4b5   : > { %2699 = vmatpush3.msra.mxu0 %v3111_v16  ;;  %v1500_v14 = vsel %vm1479_vm15, %v1422_v11, %v1418_v12  ;;  %v1458_v16 = vrot.slane %v1301_v58, %v3386_v59 }
 0x4b6   : > { %v1280_v3 = vpop.xlane.xlu1 %1279  ;;  %2700 = vmatprep.subr.mxu0 %v3115_v17  ;;  %v1289_v15 = vpop.xlane.xlu0 %1288  ;;  %v1501_v25 = vsel %vm1481_vm0, %v1426_v23, %v1500_v14 }
 0x4b7   : > { %v1430_v6 = vrot.slane %v1280_v3, %v3386_v59  ;;  %2701 = vmatpush3.msra.mxu0 %v3115_v17  ;;  %v1508_v29 = vsel %vm1481_vm0, %v1458_v16, %v1507_v24  ;;  %v1442_v34 = vrot.slane %v1289_v15, %v3386_v59 }
 0x4b8   : > { %2702 = vmatprep.subr.mxu0 %v3119_v18  ;;  %v1509_v35 = vsel %vm1483_vm2, %v1462_v32, %v1508_v29 }
 0x4b9   : > { %2703 = vmatpush3.msra.mxu0 %v3119_v18  ;;  %v1502_v26 = vsel %vm1483_vm2, %v1430_v6, %v1501_v25 }
 0x4ba   : > { %v1313_v27 = vpop.xlane.xlu1 %1312  ;;  %2704 = vmatprep.subr.mxu0 %v3123_v19  ;;  %v1286_v17 = vpop.xlane.xlu0 %1285  ;;  %v1503_v18 = vsel %vm1485_vm3, %v1434_v31, %v1502_v26 }
 0x4bb   : > { %2705 = vmatpush3.msra.mxu0 %v3123_v19  ;;  %v1438_v33 = vrot.slane %v1286_v17, %v3386_v59  ;;  %v1466_v19 = vrot.slane %v3418_v46, %v3386_v59 }
 0x4bc   : > { %2706 = vmatprep.subr.mxu0 %v3127_v20 }
 0x4bd   : > { %2707 = vmatpush3.msra.mxu0 %v3127_v20  ;;  %v1504_v7 = vsel %vm1487_vm4, %v1438_v33, %v1503_v18  ;;  %v1474_v20 = vrot.slane %v1313_v27, %v3386_v59  ;;  %v1510_v2 = vsel %vm1485_vm3, %v1466_v19, %v1509_v35 }
 0x4be   : > { %v1773_v8 = vpop.permute.xlu1 %1772  ;;  %2708 = vmatprep.subr.mxu0 %v3131_v21  ;;  %v1292_v36 = vpop.xlane.xlu0 %1291  ;;  %v1505_v37 = vsel %vm1489_vm5, %v1442_v34, %v1504_v7  ;;  %v1511_v54 = vsel %vm1487_vm4, %v1470_v38, %v1510_v2  ;;  %v259_v2 = vld [vmem:[#allocation2 + $0x40] sm:$0xff]  ;;  %v257_v38 = vld [vmem:[#allocation2 + $0x30] sm:$0xff] }
 0x4bf   : > { %2724 = vmatprep.subr.mxu1 %v1773_v8  ;;  %2709 = vmatpush3.msra.mxu0 %v3131_v21  ;;  %v1446_v30 = vrot.slane %v1292_v36, %v3386_v59 }
 0x4c0   : > { %2725 = vmatpush3.msra.mxu1 %v1773_v8  ;;  %2710 = vmatprep.subr.mxu0 %v3135_v22 }
 0x4c1   : > { %2711 = vmatpush3.msra.mxu0 %v3135_v22  ;;  %v1506_v51 = vsel %vm1491_vm6, %v1446_v30, %v1505_v37  ;;  %v1512_v22 = vsel %vm1489_vm5, %v1474_v20, %v1511_v54  ;;  %v260_v20 = vld [vmem:[#allocation2 + $0x48] sm:$0xff]  ;;  %v258_v37 = vld [vmem:[#allocation2 + $0x38] sm:$0xff] }
 0x4c2   : > { %v1769_v48 = vpop.permute.xlu1 %1768  ;;  %2712 = vmatprep.subr.mxu0 %v3145_v40  ;;  %v1316_v21 = vpop.xlane.xlu0 %1315  ;;  %v1521_v52 = vsel %vm1518_vm7, %v1506_v51, 0.0 }
 0x4c3   : > { %2713 = vmatpush3.msra.mxu0 %v3145_v40  ;;  %v1478_v58 = vrot.slane %v1316_v21, %v3386_v59  ;;  %2683 = vmatprep.mubr.msk.f32.mxu0 %vm1523_vm8, %v1521_v52 }
 0x4c4   : > { %2714 = vmatprep.subr.mxu0 %v3149_v41 }
 0x4c5   : > { %2715 = vmatpush3.msra.mxu0 %v3149_v41  ;;  %v1513_v53 = vsel %vm1491_vm6, %v1478_v58, %v1512_v22 }
 0x4c6   : > { %v1767_v28 = vpop.permute.xlu1 %1766  ;;  %2716 = vmatprep.subr.mxu0 %v3153_v42  ;;  %v1771_v63 = vpop.permute.xlu0 %1770  ;;  %v1522_v40 = vsel %vm1518_vm7, %v1513_v53, 0.0 }
 0x4c7   : > { %2717 = vmatpush3.msra.mxu0 %v3153_v42  ;;  %2726 = vmatprep.subr.mxu1 %v1771_v63 }
 0x4c8   : > { %2684 = vmatmul.mubr.msk.f32.gmra.mxu0 %vm1523_vm8, %v1522_v40  ;;  %2727 = vmatpush3.msra.mxu1 %v1771_v63 }
 0x4c9   : > { %2728 = vmatprep.subr.mxu1 %v1769_v48  ;;  %2762 = vmatprep.subr.mxu0 %v260_v20 }
 0x4ca   : > { %v1759_v59 = vpop.permute.xlu1 %1758  ;;  %2729 = vmatpush3.msra.mxu1 %v1769_v48  ;;  %v1761_v46 = vpop.permute.xlu0 %1760  ;;  %v2394_v48 = vld [vmem:[#allocation2 + $0x119] ss:$0 sm:$0xff] }
 0x4cb   : > { %2730 = vmatprep.subr.mxu1 %v1767_v28 }
 0x4cc   : > { %2731 = vmatpush3.msra.mxu1 %v1767_v28 }
 0x4cd   : > { %2732 = vmatprep.subr.mxu1 %v1761_v46 }
 0x4ce   : > { %v1755_v41 = vpop.permute.xlu1 %1754  ;;  %2733 = vmatpush3.msra.mxu1 %v1761_v46  ;;  %v1757_v0 = vpop.permute.xlu0 %1756 }
 0x4cf   : > { %2734 = vmatprep.subr.mxu1 %v1759_v59 }
 0x4d0   : > { %2735 = vmatpush3.msra.mxu1 %v1759_v59 }
 0x4d1   : > { %2736 = vmatprep.subr.mxu1 %v1757_v0 }
 0x4d2   : > { %2737 = vmatpush3.msra.mxu1 %v1757_v0  ;;  %v1749_v61 = vpop.permute.xlu0 %1748  ;;  %v1747_v42 = vpop.permute.xlu1 %1746 }
 0x4d3   : > { %2738 = vmatprep.subr.mxu1 %v1755_v41 }
 0x4d4   : > { %2739 = vmatpush3.msra.mxu1 %v1755_v41 }
 0x4d5   : > { %2740 = vmatprep.subr.mxu1 %v1749_v61 }
 0x4d6   : > { %2741 = vmatpush3.msra.mxu1 %v1749_v61  ;;  %v1745_v56 = vpop.permute.xlu0 %1744  ;;  %v1743_v1 = vpop.permute.xlu1 %1742 }
 0x4d7   : > { %2742 = vmatprep.subr.mxu1 %v1747_v42 }
 0x4d8   : > { %2743 = vmatpush3.msra.mxu1 %v1747_v42 }
 0x4d9   : > { %2744 = vmatprep.subr.mxu1 %v1745_v56 }
 0x4da   : > { %2745 = vmatpush3.msra.mxu1 %v1745_v56 }
 0x4db   : > { %2746 = vmatprep.subr.mxu1 %v1743_v1 }
 0x4dc   : > { %2747 = vmatpush3.msra.mxu1 %v1743_v1 }
 0x4dd   : > { %2748 = vmatprep.subr.mxu1 %v3162_v47 }
 0x4de   : > { %2749 = vmatpush3.msra.mxu1 %v3162_v47 }
 0x4df   : > { %2750 = vmatprep.subr.mxu1 %v3165_v49 }
 0x4e0   : > { %2751 = vmatpush3.msra.mxu1 %v3165_v49 }
 0x4e1   : > { %2752 = vmatprep.subr.mxu1 %v3157_v43 }
 0x4e2   : > { %2753 = vmatpush3.msra.mxu1 %v3157_v43 }
 0x4e3   : > { %2754 = vmatprep.subr.mxu1 %v3159_v45 }
 0x4e4   : > { %2755 = vmatpush3.msra.mxu1 %v3159_v45 }
 0x568   : > { %v2682_v4 = vpop.f32.mrf.mxu0 }
 0x569   : > { %v1622_v60 = vsub.f32 %v3218_v39, %v2682_v4 }
 0x56a   : > { %v1602_v5 = vpop.f32.mrf.mxu0 }
 0x56b   : > { %v1621_v10 = vsub.f32 %v3224_v50, %v1602_v5  ;;  %v1627_v11 = vmul.f32 1.442695, %v1622_v60  ;;  %v2395_v5 = vld [vmem:[#allocation2 + $0x11c] ss:$0 sm:$0xff] }
 0x56d   : > { %v1625_v47 = vmul.f32 1.442695, %v1621_v10 }
 0x56f   : > { %2859 = vpow2.f32 %v1625_v47 }
 0x570   : > { %2861 = vpow2.f32 %v1627_v11 }
 0x57c   : > { %v2860_v44 = vpop.eup %2859 }
 0x57d   : > { %v2862_v49 = vpop.eup %2861  ;;  %2718 = vmatprep.mubr.f32.mxu0 %v2860_v44 }
 0x57e   : > { %2719 = vmatmul.mubr.f32.vlgmr.msra.gmra.mxu0 %v2862_v49 }
 0x57f   : > { %2763 = vmatpush3.msra.mxu0 %v260_v20 }
 0x580   : > { %2764 = vmatprep.subr.mxu0 %v259_v2 }
 0x581   : > { %2765 = vmatpush3.msra.mxu0 %v259_v2 }
 0x582   : > { %2766 = vmatprep.subr.mxu0 %v258_v37 }
 0x583   : > { %2767 = vmatpush3.msra.mxu0 %v258_v37  ;;  %v264_v37 = vld [vmem:[#allocation2 + $0x68] sm:$0xff] }
 0x584   : > { %2768 = vmatprep.subr.mxu0 %v257_v38  ;;  %2787 = vmatprep.subr.mxu1 %v264_v37 }
 0x585   : > { %2769 = vmatpush3.msra.mxu0 %v257_v38  ;;  %v263_v38 = vld [vmem:[#allocation2 + $0x60] sm:$0xff] }
 0x588   : > { %v2685_v12 = vpop.f32.mrf.mxu0 }
 0x589   : > { %v1624_v43 = vsub.f32 %v3234_v55, %v2685_v12 }
 0x58a   : > { %v1612_v9 = vpop.f32.mrf.mxu0 }
 0x58b   : > { %v1623_v45 = vsub.f32 %v3240_v57, %v1612_v9  ;;  %v1631_v13 = vmul.f32 1.442695, %v1624_v43 }
 0x58d   : > { %v1629_v14 = vmul.f32 1.442695, %v1623_v45 }
 0x58f   : > { %2863 = vpow2.f32 %v1629_v14 }
 0x590   : > { %2865 = vpow2.f32 %v1631_v13 }
 0x59c   : > { %v2864_v39 = vpop.eup %2863 }
 0x59d   : > { %v2866_v50 = vpop.eup %2865  ;;  %2721 = vmatprep.mubr.f32.mxu0 %v2864_v39 }
 0x59e   : > { %2722 = vmatmul.mubr.f32.gmra.mxu0 %v2866_v50 }
 0x63e   : > { %v2720_v3 = vpop.f32.mrf.mxu0 }
 0x63f   : > { %2867 = vrcp.f32 %v2720_v3 }
 0x640   : > { %v1699_v23 = vpop.f32.mrf.mxu0 }
 0x641   : > { %2869 = vrcp.f32 %v1699_v23 }
 0x64c   : > { %v2868_v6 = vpop.eup %2867 }
 0x64d   : > { %v1723_v15 = vmul.f32 %v2868_v6, %v2720_v3 }
 0x64e   : > { %v2870_v24 = vpop.eup %2869 }
 0x64f   : > { %v1727_v16 = vsub.f32 2.0, %v1723_v15  ;;  %v1722_v55 = vmul.f32 %v2870_v24, %v1699_v23 }
 0x651   : > { %v1726_v25 = vsub.f32 2.0, %v1722_v55  ;;  %v1731_v26 = vmul.f32 %v2868_v6, %v1727_v16 }
 0x653   : > { %v1730_v57 = vmul.f32 %v2870_v24, %v1726_v25  ;;  %v1735_v29 = vmul.f32 %v2862_v49, %v1731_v26  ;;  %v2046_v26 = vsub.s32 0, %v3251_v62 }
 0x655   : > { %v1734_v27 = vmul.f32 %v2860_v44, %v1730_v57  ;;  %v2400_v44 = vld [vmem:[#allocation2 + $0x11d] ss:$0 sm:$0xff]  ;;  %v2008_v57 = vld [vmem:[%s250_s6] sm:$0xff] }
 0x656   : > { %vm2010_vm13 = vcmp.gt.f32.partialorder %v2008_v57, 0.0 }
 0x657   : > { %2756 = vmatprep.mubr.f32.mxu1 %v1734_v27  ;;  %v2009_v27 = vld [vmem:[%s250_s6 + $0x8] sm:$0xff] }
 0x658   : > { %2757 = vmatmul.mubr.f32.vlgmr.msra.gmra.mxu1 %v1735_v29  ;;  %vm2011_vm14 = vcmp.gt.f32.partialorder %v2009_v27, 0.0 }
 0x659   : > { %2788 = vmatpush3.msra.mxu1 %v264_v37 }
 0x65a   : > { %2789 = vmatprep.subr.mxu1 %v263_v38 }
 0x65b   : > { %2790 = vmatpush3.msra.mxu1 %v263_v38 }
 0x65e   : > { %v2723_v31 = vpop.f32.mrf.mxu0 }
 0x65f   : > { %2871 = vrcp.f32 %v2723_v31 }
 0x660   : > { %v1709_v17 = vpop.f32.mrf.mxu0 }
 0x661   : > { %2873 = vrcp.f32 %v1709_v17 }
 0x66c   : > { %v2872_v32 = vpop.eup %2871 }
 0x66d   : > { %v1725_v33 = vmul.f32 %v2872_v32, %v2723_v31 }
 0x66e   : > { %v2874_v18 = vpop.eup %2873 }
 0x66f   : > { %v1729_v35 = vsub.f32 2.0, %v1725_v33  ;;  %v1724_v7 = vmul.f32 %v2874_v18, %v1709_v17 }
 0x671   : > { %v1728_v8 = vsub.f32 2.0, %v1724_v7  ;;  %v1733_v19 = vmul.f32 %v2872_v32, %v1729_v35 }
 0x673   : > { %v1732_v34 = vmul.f32 %v2874_v18, %v1728_v8  ;;  %v1737_v30 = vmul.f32 %v2866_v50, %v1733_v19 }
 0x675   : > { %v1736_v36 = vmul.f32 %v2864_v39, %v1732_v34 }
 0x677   : > { %2759 = vmatprep.mubr.f32.mxu1 %v1736_v36 }
 0x678   : > { %2760 = vmatmul.mubr.f32.gmra.mxu1 %v1737_v30 }
 0x718   : > { %v2758_v51 = vpop.f32.mrf.mxu1 }
 0x719   : > { %v1864_v21 = vmul.f32 0.25, %v2758_v51 }
 0x71a   : > { %v1844_v52 = vpop.f32.mrf.mxu1 }
 0x71b   : > { %v1872_v54 = vadd.f32 %v2394_v48, %v1864_v21  ;;  %v1863_v58 = vmul.f32 0.25, %v1844_v52 }
 0x71d   : > { %v1871_v22 = vadd.f32 %v2394_v48, %v1863_v58  ;;  %v1880_v28 = vmul.f32 0.1, %v1872_v54  ;;  %vm1876_vm9 = vcmp.gt.f32.partialorder %v1872_v54, 0.0 }
 0x71f   : > { %v1879_v53 = vmul.f32 0.1, %v1871_v22  ;;  %vm1875_vm10 = vcmp.gt.f32.partialorder %v1871_v22, 0.0  ;;  %v1884_v40 = vsel %vm1876_vm9, %v1872_v54, %v1880_v28 }
 0x721   : > { %v1883_v63 = vsel %vm1875_vm10, %v1871_v22, %v1879_v53 }
 0x722   : > { %2770 = vmatprep.mubr.msk.f32.mxu0 %vm415_vm1, %v1883_v63 }
 0x723   : > { %2771 = vmatmul.mubr.msk.f32.vlgmr.msra.gmra.mxu0 %vm415_vm1, %v1884_v40 }
 0x738   : > { %v2761_v59 = vpop.f32.mrf.mxu1 }
 0x739   : > { %v1866_v46 = vmul.f32 0.25, %v2761_v59 }
 0x73a   : > { %v1854_v41 = vpop.f32.mrf.mxu1 }
 0x73b   : > { %v1874_v0 = vadd.f32 %v2394_v48, %v1866_v46  ;;  %v1865_v61 = vmul.f32 0.25, %v1854_v41  ;;  %v261_v41 = vld [vmem:[#allocation2 + $0x50] sm:$0xff] }
 0x73d   : > { %v1873_v42 = vadd.f32 %v2394_v48, %v1865_v61  ;;  %vm1878_vm11 = vcmp.gt.f32.partialorder %v1874_v0, 0.0  ;;  %v1882_v56 = vmul.f32 0.1, %v1874_v0  ;;  %v262_v48 = vld [vmem:[#allocation2 + $0x58] sm:$0xff] }
 0x73e   : > { %2791 = vmatprep.subr.mxu1 %v262_v48 }
 0x73f   : > { %v1881_v1 = vmul.f32 0.1, %v1873_v42  ;;  %v1886_v4 = vsel %vm1878_vm11, %v1874_v0, %v1882_v56  ;;  %vm1877_vm12 = vcmp.gt.f32.partialorder %v1873_v42, 0.0  ;;  %2792 = vmatpush3.msra.mxu1 %v262_v48 }
 0x740   : > { %2776 = vmatprep.subr.mxu0 %v1886_v4  ;;  %2793 = vmatprep.subr.mxu1 %v261_v41 }
 0x741   : > { %2777 = vmatpush3.msra.mxu0 %v1886_v4  ;;  %v1885_v60 = vsel %vm1877_vm12, %v1873_v42, %v1881_v1  ;;  %2794 = vmatpush3.msra.mxu1 %v261_v41  ;;  %v2403_v42 = vld [vmem:[#allocation2 + $0x11e] ss:$0 sm:$0xff] }
 0x742   : > { %2773 = vmatprep.mubr.msk.f32.mxu0 %vm415_vm1, %v1885_v60  ;;  %2778 = vmatprep.subr.mxu0 %v1885_v60 }
 0x743   : > { %2774 = vmatmul.mubr.msk.f32.gmra.mxu0 %vm415_vm1, %v1886_v4 }
 0x744   : > { %2779 = vmatpush3.msra.mxu0 %v1885_v60 }
 0x745   : > { %2780 = vmatprep.subr.mxu0 %v1884_v40 }
 0x746   : > { %2781 = vmatpush3.msra.mxu0 %v1884_v40 }
 0x747   : > { %2782 = vmatprep.subr.mxu0 %v1883_v63 }
 0x748   : > { %2783 = vmatpush3.msra.mxu0 %v1883_v63 }
 0x7e3   : > { %v2772_v10 = vpop.f32.mrf.mxu0 }
 0x7e4   : > { %v1975_v11 = vadd.f32 %v2772_v10, %v2395_v5 }
 0x7e5   : > { %v1969_v47 = vpop.f32.mrf.mxu0 }
 0x7e6   : > { %v1989_v49 = vmax.f32 %v1975_v11, 0.0  ;;  %v1970_v12 = vadd.f32 %v2395_v5, %v1969_v47 }
 0x7e8   : > { %v1988_v43 = vmax.f32 %v1970_v12, 0.0  ;;  %v1997_v9 = vmul.f32 %v2400_v44, %v1989_v49 }
 0x7ea   : > { %2002 = vadd.xlane.f32.xlu1 %v1997_v9  ;;  %v1996_v45 = vmul.f32 %v2400_v44, %v1988_v43 }
 0x7ec   : > { %2000 = vadd.xlane.f32.xlu0 %v1996_v45 }
 0x803   : > { %v2775_v13 = vpop.f32.mrf.mxu0 }
 0x804   : > { %v1985_v39 = vadd.f32 %v2775_v13, %v2395_v5 }
 0x805   : > { %v1979_v14 = vpop.f32.mrf.mxu0 }
 0x806   : > { %v1980_v50 = vadd.f32 %v2395_v5, %v1979_v14  ;;  %v1991_v23 = vmax.f32 %v1985_v39, 0.0 }
 0x808   : > { %v1990_v3 = vmax.f32 %v1980_v50, 0.0  ;;  %v1999_v15 = vmul.f32 %v2400_v44, %v1991_v23 }
 0x80a   : > { %v1998_v6 = vmul.f32 %v2400_v44, %v1990_v3 }
 0x80c   : > { %2004 = vadd.xlane.f32.xlu0 %v1998_v6 }
 0x810   : > { %2006 = vadd.xlane.f32.xlu0 %v1999_v15 }
 0x873   : > { %v2003_v16 = vpop.xlane.xlu1 %2002 }
 0x875   : > { %v2001_v24 = vpop.xlane.xlu0 %2000 }
 0x876   : > { %2012 = vxpose.xlu1.b32.start [1/4] (short) (narrow) %v2001_v24, 8 }
 0x87a   : > { %2013 = vxpose.xlu1.b32.cont [2/4] (short) (narrow) %v2003_v16, 8 }
 0x895   : > { %v2005_v55 = vpop.xlane.xlu0 %2004 }
 0x896   : > { %2014 = vxpose.xlu1.b32.cont [3/4] (short) (narrow) %v2005_v55, 8 }
 0x899   : > { %v2007_v25 = vpop.xlane.xlu0 %2006 }
 0x89a   : > { %2015 = vxpose.xlu1.b32.end [4/4] (short) (narrow) %v2007_v25, 8 }
 0x90a   : > { %v2028_v29 = vpop.trf.xlu1 }
 0x90b   : > { %v2047_v31 = vrot.slane %v2028_v29, %v2046_v26 }
 0x90d   : > { %v2048_v17 = vsel %vm2010_vm13, %v2047_v31, -1e+30  ;;  %v2049_v33 = vsel %vm2011_vm14, %v2047_v31, -1e+30 }
 0x90e   : > { %v2050_v32 = vsel %vm415_vm1, %v2048_v17, -inf  ;;  %v2053_v18 = vsel %vm415_vm1, %v2049_v33, -inf }
 0x90f   : > { %2051 = vmax.xlane.f32.xlu0 %v2050_v32 }
 0x913   : > { %2054 = vmax.xlane.f32.xlu0 %v2053_v18 }
 0x998   : > { %v2052_v35 = vpop.xlane.xlu0 %2051 }
 0x999   : > { %v2056_v7 = vsub.f32 %v2048_v17, %v2052_v35 }
 0x99b   : > { %v2058_v8 = vmul.f32 1.442695, %v2056_v7 }
 0x99c   : > { %v2055_v19 = vpop.xlane.xlu0 %2054 }
 0x99d   : > { %2875 = vpow2.f32 %v2058_v8  ;;  %v2057_v62 = vsub.f32 %v2049_v33, %v2055_v19 }
 0x99f   : > { %v2060_v34 = vmul.f32 1.442695, %v2057_v62 }
 0x9a1   : > { %2877 = vpow2.f32 %v2060_v34 }
 0x9aa   : > { %v2876_v36 = vpop.eup %2875 }
 0x9ab   : > { %v2062_v30 = vsel %vm415_vm1, %v2876_v36, 0.0 }
 0x9ac   : > { %2063 = vadd.xlane.f32.xlu0 %v2062_v30 }
 0x9ae   : > { %v2878_v20 = vpop.eup %2877 }
 0x9af   : > { %v2065_v2 = vsel %vm415_vm1, %v2878_v20, 0.0 }
 0x9b0   : > { %2066 = vadd.xlane.f32.xlu0 %v2065_v2 }
 0xa35   : > { %v2064_v51 = vpop.xlane.xlu0 %2063 }
 0xa36   : > { %2879 = vrcp.f32 %v2064_v51 }
 0xa39   : > { %v2067_v21 = vpop.xlane.xlu0 %2066 }
 0xa3a   : > { %2881 = vrcp.f32 %v2067_v21 }
 0xa43   : > { %v2880_v52 = vpop.eup %2879 }
 0xa44   : > { %v2070_v54 = vmul.f32 %v2880_v52, %v2064_v51 }
 0xa46   : > { %v2072_v58 = vsub.f32 2.0, %v2070_v54 }
 0xa47   : > { %v2882_v22 = vpop.eup %2881 }
 0xa48   : > { %v2074_v28 = vmul.f32 %v2880_v52, %v2072_v58  ;;  %v2071_v53 = vmul.f32 %v2882_v22, %v2067_v21 }
 0xa4a   : > { %v2076_v63 = vmul.f32 %v2876_v36, %v2074_v28  ;;  %v2073_v40 = vsub.f32 2.0, %v2071_v53 }
 0xa4c   : > { %v2075_v59 = vmul.f32 %v2882_v22, %v2073_v40  ;;  %2784 = vmatprep.mubr.msk.f32.mxu0 %vm415_vm1, %v2076_v63 }
 0xa4e   : > { %v2077_v46 = vmul.f32 %v2878_v20, %v2075_v59 }
 0xa50   : > { %2785 = vmatmul.mubr.msk.f32.vlgmr.msra.gmra.mxu0 %vm415_vm1, %v2077_v46 }
 0xb10   : > { %v2786_v0 = vpop.f32.mrf.mxu0 }
 0xb12   : > { %v2150_v61 = vpop.f32.mrf.mxu0 }
 0xb13   : > { %2795 = vmatprep.mubr.msk.f32.mxu1 %vm415_vm1, %v2150_v61 }
 0xb14   : > { %2796 = vmatmul.mubr.msk.f32.vlgmr.msra.gmra.mxu1 %vm415_vm1, %v2786_v0 }
 0xbd4   : > { %v2797_v56 = vpop.f32.mrf.mxu1 }
 0xbd5   : > { %v2241_v1 = vadd.f32 %v2797_v56, %v2403_v42 }
 0xbd6   : > { %v2235_v4 = vpop.f32.mrf.mxu1 }
 0xbd7   : > { %2245 = vst [vmem:[%s235_s9 + $0x8] sm:$0xff] %v2241_v1  ;;  %v2236_v60 = vadd.f32 %v2403_v42, %v2235_v4 }
 0xbd9   : > { %2244 = vst [vmem:[%s235_s9] sm:$0xff] %v2236_v60 }
 0xbda   : > { %2922 = shalt.err (!%p2919_p0)
}
 0xbdb   : > { %s2923_s28 = scalar_lea.hbm %s3529_s14, 256  ;;  %s2927_s5 = scalar_lea.hbm %s3575_s4, 512 }
 0xbdc   : > { %p2924_p1 = scmp.ne.s32.totalorder %s3529_s14, %s2923_s28  ;;  %p2928_p4 = scmp.lt.s32.totalorder %s3529_s14, %s3575_s4 }
 0xbdd   : > { %p2929_p7 = scmp.lt.s32.totalorder %s2927_s5, %s2923_s28 }
 0xbde   : > { %p2925_p2 = pnand %p2924_p1, %p3051_p5 }
 0xbdf   : > { %p2930_p8 = por %p2929_p7, %p2928_p4 }
 0xbe0   : > { %p2926_p3 = pneg %p2925_p2 }
 0xbe2   : > { %p2931_p6 = pnand %p2930_p8, %p2926_p3 }
 0xbe4   : > { %2934 = shalt.err (!%p2931_p6)
}
 0xbe5   : > { %s2986_s8 = smov 128   ;;  %s2987_s9 = smov 8  }
 0xbe6   : > { %2802 = dma.vmem_to_hbm [thread:$0]  (%p3051_p5), %s3524_s10, 256, %s3529_s14, %s3531_s20, %s2986_s8, %s2986_s8, %s2987_s9  }
 0xbe7 PF: > { %p2814_p9 = scmp.ge.s32.totalorder %s2973_s18, 2  ;;  %s2275_s11 = sand.u32 1, %s2961_s15  }
 0xbe8   : > { %p3579_p10 = scmp.ne.s32.totalorder %s3577_s26, 0  ;;  %s2276_s12 = scalar_lea.sflag [#allocation4], %s2275_s11 }
 0xbea   : > { %p2809_p11 = pnand %p2814_p9, %p3579_p10 }
 0xbec   : > { %p2810_p12 = pneg %p2809_p11 }
 0xbee   : > { %2956 = dma.done.wait (%p2810_p12), %s2276_s12, 256  }
 0xbef   : > { %2958 = vsyncadd (%p2810_p12), %s2276_s12, 4294967040  ;;  %p15_p13 = scmp.ge.s32.totalorder %s3038_s21, 4   ;;  %s3580_s15 = smov %s2965_s16 }
 0xbf0   : > { %s3581_s16 = smov %s2969_s17  ;;  %s3582_s17 = smov %s3049_s24 }
 0xbf1   : > { %s3583_s18 = smov %s3038_s21  ;;  %17 = sbr.rel (!%p15_p13) target bundleno = 4 (0x4), region = 82 }
 0xbf6   :  { %2281 = vsyncpa [#allocation3], 1 }
 0xbf7   :  { %2283 = vsyncpa [#allocation3 + $0x1], 1 }
 0xbf8   :  { %2284 = vsyncpa [#allocation4], 1 }
 0xbf9   :  { %2286 = vsyncpa [#allocation4 + $0x1], 1 }

</bundles_post_ra>
